<compile_context>
chip_gen: v6e
topology: v6e:2x2x1
jax: 0.10.0
libtpu: 0.0.40
codegen_flags: <defaults>
</compile_context>

<pallas_src>
import numpy as np
import jax
import jax.numpy as jnp
from jax import lax
from jax.experimental import pallas as pl
from jax.experimental.pallas import tpu as pltpu

# ----- config (consistent with OursModel.__init__) -----------------------------
NUM_MODES = 2
NUM_FEATURES = 2
NUM_NODES = 4
LSTM_HIDDEN = 16
NUM_LAYERS = 2          # kernel below is written for exactly 2 layers
EXT_FEATURES = 4
NUM_PRED = 8            # == sequence length (required by the final reshape)
BATCH = 2
SEQ = NUM_PRED

D_IN = NUM_MODES * NUM_FEATURES * NUM_NODES * NUM_NODES   # 64 : LSTM input size
H = NUM_MODES * LSTM_HIDDEN                                # 32 : LSTM hidden size
D_OUT = D_IN                                               # 64 : linear out features


# ----- Pallas kernel ------------------------------------------------------------
def ours_kernel(enc_ref, ext_ref,
                wih0_ref, bcomb_ref, wrec_ref,
                wlh_ref, wlext_ref, bl_ref,
                out_ref):
    # enc_ref : (T*B, D_IN)   time-major rows (t*B + b)
    # ext_ref : (T*B, E)      time-major
    # wih0_ref: (D_IN, 8H)    layer-0 input weights in packed gate layout
    # bcomb_ref: (1, 8H)      fused biases (b0 | b1) in packed gate layout
    # wrec_ref: (2H, 8H)      packed recurrent weight [[whh0, wih1],[0, whh1]]
    # wlh_ref : (2H, D_OUT)   [0 ; wl_h] (selects the layer-1 half of the state)
    # wlext_ref:(E, D_OUT)    ext part of the final linear
    # bl_ref  : (1, D_OUT)
    # out_ref : (T*B, D_OUT)  time-major
    #
    # Packed gate layout (width 8H): [i0 i1 f0 f1 g0 g1 o0 o1], each H lanes.
    # i/f/o columns of every weight/bias were pre-scaled by 0.5 so that a single
    # tanh + (0.5*t + 0.5) reproduces sigmoid exactly.
    B, T, Hh = BATCH, SEQ, H
    G = 2 * Hh            # packed state width  [h0 | h1]
    W = 8 * Hh            # packed gate width

    bcomb = bcomb_ref[...]
    wrec = wrec_ref[...]
    wlh = wlh_ref[...]

    # ---- prologue: independent of the recurrence (MXU filler) -----------------
    g_pre = jnp.dot(enc_ref[...], wih0_ref[...],
                    preferred_element_type=jnp.float32) + bcomb            # (T*B, 8H)
    ext_part = jnp.dot(ext_ref[...], wlext_ref[...],
                       preferred_element_type=jnp.float32) + bl_ref[...]   # (T*B, D_OUT)

    def cell(gates, c):
        # combined LSTM cell for both layers; sigmoid folded into ONE tanh.
        t = jnp.tanh(gates)                 # full packed gate vreg -> EUP
        a = 0.5 * t + 0.5
        i = a[:, 0:2 * Hh]                  # [i0 | i1]
        f = a[:, 2 * Hh:4 * Hh]             # [f0 | f1]
        g = t[:, 4 * Hh:6 * Hh]             # [g0 | g1]  (plain tanh)
        o = a[:, 6 * Hh:8 * Hh]             # [o0 | o1]
        c_new = f * c + i * g
        h_new = o * jnp.tanh(c_new)
        return h_new, c_new

    def emit(t_idx, h_packed):
        # y_t = h1_t @ wl_h + (ext_t @ wl_ext + bl); wl_h is zero-padded over
        # the layer-0 half so the packed state feeds the MXU directly.
        y = (jnp.dot(h_packed, wlh, preferred_element_type=jnp.float32)
             + ext_part[t_idx * B:(t_idx + 1) * B, :])
        out_ref[pl.ds(t_idx * B, B), :] = y.astype(out_ref.dtype)

    # ---- stage 0: layer-0 cell at t=0 (zero state -> no recurrent matmul).
    #      The layer-1 half of the result is garbage (no layer-1 cell has run
    #      yet) so it is masked back to zero.
    h, c = cell(g_pre[0:B, :], jnp.zeros((B, G), jnp.float32))
    lane = lax.broadcasted_iota(jnp.int32, (B, G), 1)
    keep0 = (lane < Hh).astype(jnp.float32)
    h = h * keep0
    c = c * keep0

    # ---- wavefront stages 1..T-1: layer-0 cell at time s AND layer-1 cell at
    #      time s-1, both gate sets from a single packed MXU op. --------------
    for s in range(1, T):
        rec = jnp.dot(h, wrec, preferred_element_type=jnp.float32)         # (B, 8H)
        h, c = cell(g_pre[s * B:(s + 1) * B, :] + rec, c)
        emit(s - 1, h)          # h1_{s-1} is ready -> store its output rows now

    # ---- stage T: trailing layer-1 cell at time T-1 (layer-0 half unused) ----
    rec = jnp.dot(h, wrec, preferred_element_type=jnp.float32)
    h, c = cell(bcomb + rec, c)
    emit(T - 1, h)

    # Dropout(0.5) reproduced in eval mode (identity).
    # TODO(synk): training-mode stochastic dropout (pltpu.prng_*) not emitted.


# ----- wrapper ------------------------------------------------------------------
def ours_forward(enc, ext, kernel_params):
    # enc: (B, T, D_IN), ext: (B, T, EXT_FEATURES)  (batch_first, like PyTorch)
    B, T, _ = enc.shape
    # (B,T)->(T,B) reorders live here as XLA transposes of ~4 KiB tensors,
    # never inside the kernel.
    enc_tm = jnp.swapaxes(enc, 0, 1).reshape(T * B, D_IN).astype(jnp.float32)
    ext_tm = jnp.swapaxes(ext, 0, 1).reshape(T * B, EXT_FEATURES).astype(jnp.float32)

    n_in = 2 + len(kernel_params)
    out_tm = pl.pallas_call(
        ours_kernel,
        out_shape=jax.ShapeDtypeStruct((T * B, D_OUT), jnp.float32),
        in_specs=[pl.BlockSpec(memory_space=pltpu.MemorySpace.VMEM)] * n_in,
        out_specs=pl.BlockSpec(memory_space=pltpu.MemorySpace.VMEM),
    )(enc_tm, ext_tm, *kernel_params)

    out_btd = jnp.swapaxes(out_tm.reshape(T, B, D_OUT), 0, 1)   # (B, T, D_OUT)
    return out_btd.reshape(B, NUM_PRED, -1, NUM_MODES)


# ----- deterministic parameter init (shapes match nn.LSTM / nn.Linear) ----------
def init_params(key):
    ks = jax.random.split(key, 10)
    s = 1.0 / np.sqrt(H)

    def u(k, shape, lim):
        return jax.random.uniform(k, shape, jnp.float32, -lim, lim)

    # PyTorch LSTM parameter layout: weight_ih_lX (4H, in), weight_hh_lX (4H, H),
    # bias_ih_lX (4H,), bias_hh_lX (4H,); gate order i, f, g, o.
    wih0 = u(ks[0], (4 * H, D_IN), s)
    whh0 = u(ks[1], (4 * H, H), s)
    bih0 = u(ks[2], (4 * H,), s)
    bhh0 = u(ks[3], (4 * H,), s)
    wih1 = u(ks[4], (4 * H, H), s)
    whh1 = u(ks[5], (4 * H, H), s)
    bih1 = u(ks[6], (4 * H,), s)
    bhh1 = u(ks[7], (4 * H,), s)

    # nn.Linear(H + ext_features -> D_OUT), xavier_uniform weight.
    fan_in, fan_out = H + EXT_FEATURES, D_OUT
    xav = np.sqrt(6.0 / (fan_in + fan_out))
    wl = u(ks[8], (D_OUT, H + EXT_FEATURES), xav)
    bl = u(ks[9], (D_OUT,), 1.0 / np.sqrt(fan_in))

    # ---- glue: pack weights for the wavefront kernel ---------------------------
    # Packed gate layout (width 8H): [i0 i1 f0 f1 g0 g1 o0 o1].
    # i/f/o columns are pre-scaled by 0.5 (sigmoid = 0.5*tanh(0.5x)+0.5 in-kernel).
    def gates_T(w):                 # w: (4H, in) -> 4 blocks of (in, H)
        wT = w.T
        return [wT[:, k * H:(k + 1) * H] for k in range(4)]

    def gates_b(b):                 # b: (4H,) -> 4 blocks of (H,)
        return [b[k * H:(k + 1) * H] for k in range(4)]

    i0t, f0t, g0t, o0t = gates_T(wih0)       # each (D_IN, H)
    ri0, rf0, rg0, ro0 = gates_T(whh0)       # each (H, H)
    i1t, f1t, g1t, o1t = gates_T(wih1)       # each (H, H)
    ri1, rf1, rg1, ro1 = gates_T(whh1)       # each (H, H)
    bi0, bf0, bg0, bo0 = gates_b(bih0 + bhh0)
    bi1, bf1, bg1, bo1 = gates_b(bih1 + bhh1)

    zD = jnp.zeros((D_IN, H), jnp.float32)
    zH = jnp.zeros((H, H), jnp.float32)

    wih0_comb = jnp.concatenate(
        [0.5 * i0t, zD, 0.5 * f0t, zD, g0t, zD, 0.5 * o0t, zD], axis=1)      # (D_IN, 8H)
    b_comb = jnp.concatenate(
        [0.5 * bi0, 0.5 * bi1, 0.5 * bf0, 0.5 * bf1,
         bg0, bg1, 0.5 * bo0, 0.5 * bo1])[None, :]                            # (1, 8H)
    wrec_top = jnp.concatenate(
        [0.5 * ri0, 0.5 * i1t, 0.5 * rf0, 0.5 * f1t,
         rg0, g1t, 0.5 * ro0, 0.5 * o1t], axis=1)                             # (H, 8H)
    wrec_bot = jnp.concatenate(
        [zH, 0.5 * ri1, zH, 0.5 * rf1, zH, rg1, zH, 0.5 * ro1], axis=1)       # (H, 8H)
    wrec_comb = jnp.concatenate([wrec_top, wrec_bot], axis=0)                 # (2H, 8H)

    wlh_pad = jnp.concatenate(
        [jnp.zeros((H, D_OUT), jnp.float32), wl[:, :H].T], axis=0)            # (2H, D_OUT)
    wlext = wl[:, H:].T                                                        # (E, D_OUT)
    bl_row = bl[None, :]                                                       # (1, D_OUT)

    kernel_params = (wih0_comb, b_comb, wrec_comb, wlh_pad, wlext, bl_row)
    raw = dict(wih0=wih0, whh0=whh0, bih0=bih0, bhh0=bhh0,
               wih1=wih1, whh1=whh1, bih1=bih1, bhh1=bhh1, wl=wl, bl=bl)
    return kernel_params, raw


# ----- pure-JAX reference (mirrors the PyTorch forward) --------------------------
def reference(enc, ext, raw):
    B = enc.shape[0]

    def lstm_layer(x, wih, whh, bih, bhh):
        Hh = whh.shape[1]

        def step(carry, xt):
            h, c = carry
            g = xt @ wih.T + bih + h @ whh.T + bhh
            i = jax.nn.sigmoid(g[:, :Hh])
            f = jax.nn.sigmoid(g[:, Hh:2 * Hh])
            gg = jnp.tanh(g[:, 2 * Hh:3 * Hh])
            o = jax.nn.sigmoid(g[:, 3 * Hh:])
            c = f * c + i * gg
            h = o * jnp.tanh(c)
            return (h, c), h

        init = (jnp.zeros((B, Hh), jnp.float32), jnp.zeros((B, Hh), jnp.float32))
        _, ys = lax.scan(step, init, jnp.transpose(x, (1, 0, 2)))
        return jnp.transpose(ys, (1, 0, 2))

    y = lstm_layer(enc, raw['wih0'], raw['whh0'], raw['bih0'], raw['bhh0'])
    y = lstm_layer(y, raw['wih1'], raw['whh1'], raw['bih1'], raw['bhh1'])
    out = jnp.concatenate([y, ext], axis=-1) @ raw['wl'].T + raw['bl']
    return out.reshape(B, NUM_PRED, -1, NUM_MODES)


if __name__ == "__main__":
    key = jax.random.PRNGKey(0)
    k_enc, k_ext, k_par = jax.random.split(key, 3)

    enc = jax.random.normal(k_enc, (BATCH, SEQ, D_IN), jnp.float32)
    ext = jax.random.normal(k_ext, (BATCH, SEQ, EXT_FEATURES), jnp.float32)
    kernel_params, raw = init_params(k_par)

    out = ours_forward(enc, ext, kernel_params)
    out = jax.block_until_ready(out)

    ref = jax.block_until_ready(reference(enc, ext, raw))
    assert out.shape == (BATCH, NUM_PRED, D_OUT // NUM_MODES, NUM_MODES), out.shape
    np.testing.assert_allclose(np.asarray(out), np.asarray(ref), rtol=1e-4, atol=1e-4)

    print("KERNEL_OK")
</pallas_src>

<mosaic_0001>
module attributes {stable_mosaic.version = 11 : i64} {
  func.func @ours_kernel(%arg0: memref<16x64xf32, #tpu.memory_space<vmem>>, %arg1: memref<16x4xf32, #tpu.memory_space<vmem>>, %arg2: memref<64x256xf32, #tpu.memory_space<vmem>>, %arg3: memref<1x256xf32, #tpu.memory_space<vmem>>, %arg4: memref<64x256xf32, #tpu.memory_space<vmem>>, %arg5: memref<64x64xf32, #tpu.memory_space<vmem>>, %arg6: memref<4x64xf32, #tpu.memory_space<vmem>>, %arg7: memref<1x64xf32, #tpu.memory_space<vmem>>, %arg8: memref<16x64xf32, #tpu.memory_space<vmem>>) attributes {dimension_semantics = [], scalar_prefetch = 0 : i64, scratch_operands = 0 : i64, tpu.core_type = #tpu.core_type<tc>} {
    %c0 = arith.constant 0 : index
    %c0_0 = arith.constant 0 : index
    %0 = vector.load %arg3[%c0, %c0_0] : memref<1x256xf32, #tpu.memory_space<vmem>>, vector<1x256xf32>
    %c0_1 = arith.constant 0 : index
    %c0_2 = arith.constant 0 : index
    %1 = vector.load %arg4[%c0_1, %c0_2] : memref<64x256xf32, #tpu.memory_space<vmem>>, vector<64x256xf32>
    %c0_3 = arith.constant 0 : index
    %c0_4 = arith.constant 0 : index
    %2 = vector.load %arg5[%c0_3, %c0_4] : memref<64x64xf32, #tpu.memory_space<vmem>>, vector<64x64xf32>
    %c0_5 = arith.constant 0 : index
    %c0_6 = arith.constant 0 : index
    %3 = vector.load %arg0[%c0_5, %c0_6] : memref<16x64xf32, #tpu.memory_space<vmem>>, vector<16x64xf32>
    %c0_7 = arith.constant 0 : index
    %c0_8 = arith.constant 0 : index
    %4 = vector.load %arg2[%c0_7, %c0_8] : memref<64x256xf32, #tpu.memory_space<vmem>>, vector<64x256xf32>
    %cst = arith.constant dense<0.000000e+00> : vector<16x256xf32>
    %5 = tpu.matmul %3, %4, %cst {dimension_numbers = #tpu.dot_dimension_numbers<[1], [0], [0], [1], [0, 0, 1, 1], [], []>} : vector<16x64xf32>, vector<64x256xf32>, vector<16x256xf32> -> vector<16x256xf32>
    %6 = vector.broadcast %0 : vector<1x256xf32> to vector<16x256xf32>
    %7 = arith.addf %5, %6 : vector<16x256xf32>
    %c0_9 = arith.constant 0 : index
    %c0_10 = arith.constant 0 : index
    %8 = vector.load %arg1[%c0_9, %c0_10] : memref<16x4xf32, #tpu.memory_space<vmem>>, vector<16x4xf32>
    %c0_11 = arith.constant 0 : index
    %c0_12 = arith.constant 0 : index
    %9 = vector.load %arg6[%c0_11, %c0_12] : memref<4x64xf32, #tpu.memory_space<vmem>>, vector<4x64xf32>
    %cst_13 = arith.constant dense<0.000000e+00> : vector<16x64xf32>
    %10 = tpu.matmul %8, %9, %cst_13 {dimension_numbers = #tpu.dot_dimension_numbers<[1], [0], [0], [1], [0, 0, 1, 1], [], []>} : vector<16x4xf32>, vector<4x64xf32>, vector<16x64xf32> -> vector<16x64xf32>
    %c0_14 = arith.constant 0 : index
    %c0_15 = arith.constant 0 : index
    %11 = vector.load %arg7[%c0_14, %c0_15] : memref<1x64xf32, #tpu.memory_space<vmem>>, vector<1x64xf32>
    %12 = vector.broadcast %11 : vector<1x64xf32> to vector<16x64xf32>
    %13 = arith.addf %10, %12 : vector<16x64xf32>
    %14 = vector.extract_strided_slice %7 {offsets = [0, 0], sizes = [2, 256], strides = [1, 1]} : vector<16x256xf32> to vector<2x256xf32>
    %cst_16 = arith.constant 0.000000e+00 : f32
    %15 = vector.broadcast %cst_16 : f32 to vector<2x64xf32>
    %16 = math.tanh %14 : vector<2x256xf32>
    %cst_17 = arith.constant 5.000000e-01 : f32
    %17 = vector.broadcast %cst_17 : f32 to vector<2x256xf32>
    %18 = arith.mulf %17, %16 : vector<2x256xf32>
    %cst_18 = arith.constant 5.000000e-01 : f32
    %19 = vector.broadcast %cst_18 : f32 to vector<2x256xf32>
    %20 = arith.addf %18, %19 : vector<2x256xf32>
    %21 = vector.extract_strided_slice %20 {offsets = [0, 0], sizes = [2, 64], strides = [1, 1]} : vector<2x256xf32> to vector<2x64xf32>
    %22 = vector.extract_strided_slice %20 {offsets = [0, 64], sizes = [2, 64], strides = [1, 1]} : vector<2x256xf32> to vector<2x64xf32>
    %23 = vector.extract_strided_slice %16 {offsets = [0, 128], sizes = [2, 64], strides = [1, 1]} : vector<2x256xf32> to vector<2x64xf32>
    %24 = vector.extract_strided_slice %20 {offsets = [0, 192], sizes = [2, 64], strides = [1, 1]} : vector<2x256xf32> to vector<2x64xf32>
    %25 = arith.mulf %22, %15 : vector<2x64xf32>
    %26 = arith.mulf %21, %23 : vector<2x64xf32>
    %27 = arith.addf %25, %26 : vector<2x64xf32>
    %28 = math.tanh %27 : vector<2x64xf32>
    %29 = arith.mulf %24, %28 : vector<2x64xf32>
    %30 = tpu.iota {dimensions = array<i32: 1>} : vector<2x64xi32>
    %c32_i32 = arith.constant 32 : i32
    %31 = vector.broadcast %c32_i32 : i32 to vector<2x64xi32>
    %32 = arith.cmpi slt, %30, %31 : vector<2x64xi32>
    %33 = arith.extui %32 : vector<2x64xi1> to vector<2x64xi32>
    %34 = arith.sitofp %33 : vector<2x64xi32> to vector<2x64xf32>
    %35 = arith.mulf %29, %34 : vector<2x64xf32>
    %36 = arith.mulf %27, %34 : vector<2x64xf32>
    %cst_19 = arith.constant dense<0.000000e+00> : vector<2x256xf32>
    %37 = tpu.matmul %35, %1, %cst_19 {dimension_numbers = #tpu.dot_dimension_numbers<[1], [0], [0], [1], [0, 0, 1, 1], [], []>} : vector<2x64xf32>, vector<64x256xf32>, vector<2x256xf32> -> vector<2x256xf32>
    %38 = vector.extract_strided_slice %7 {offsets = [2, 0], sizes = [2, 256], strides = [1, 1]} : vector<16x256xf32> to vector<2x256xf32>
    %39 = arith.addf %38, %37 : vector<2x256xf32>
    %40 = math.tanh %39 : vector<2x256xf32>
    %cst_20 = arith.constant 5.000000e-01 : f32
    %41 = vector.broadcast %cst_20 : f32 to vector<2x256xf32>
    %42 = arith.mulf %41, %40 : vector<2x256xf32>
    %cst_21 = arith.constant 5.000000e-01 : f32
    %43 = vector.broadcast %cst_21 : f32 to vector<2x256xf32>
    %44 = arith.addf %42, %43 : vector<2x256xf32>
    %45 = vector.extract_strided_slice %44 {offsets = [0, 0], sizes = [2, 64], strides = [1, 1]} : vector<2x256xf32> to vector<2x64xf32>
    %46 = vector.extract_strided_slice %44 {offsets = [0, 64], sizes = [2, 64], strides = [1, 1]} : vector<2x256xf32> to vector<2x64xf32>
    %47 = vector.extract_strided_slice %40 {offsets = [0, 128], sizes = [2, 64], strides = [1, 1]} : vector<2x256xf32> to vector<2x64xf32>
    %48 = vector.extract_strided_slice %44 {offsets = [0, 192], sizes = [2, 64], strides = [1, 1]} : vector<2x256xf32> to vector<2x64xf32>
    %49 = arith.mulf %46, %36 : vector<2x64xf32>
    %50 = arith.mulf %45, %47 : vector<2x64xf32>
    %51 = arith.addf %49, %50 : vector<2x64xf32>
    %52 = math.tanh %51 : vector<2x64xf32>
    %53 = arith.mulf %48, %52 : vector<2x64xf32>
    %cst_22 = arith.constant dense<0.000000e+00> : vector<2x64xf32>
    %54 = tpu.matmul %53, %2, %cst_22 {dimension_numbers = #tpu.dot_dimension_numbers<[1], [0], [0], [1], [0, 0, 1, 1], [], []>} : vector<2x64xf32>, vector<64x64xf32>, vector<2x64xf32> -> vector<2x64xf32>
    %55 = vector.extract_strided_slice %13 {offsets = [0, 0], sizes = [2, 64], strides = [1, 1]} : vector<16x64xf32> to vector<2x64xf32>
    %56 = arith.addf %54, %55 : vector<2x64xf32>
    %c0_23 = arith.constant 0 : index
    %c0_24 = arith.constant 0 : index
    %57 = vector.load %arg8[%c0_23, %c0_24] : memref<16x64xf32, #tpu.memory_space<vmem>>, vector<2x64xf32>
    tpu.vector_store %arg8[%c0_23, %c0_24], %56 {strides = array<i32>} : memref<16x64xf32, #tpu.memory_space<vmem>>, vector<2x64xf32>,
    %cst_25 = arith.constant dense<0.000000e+00> : vector<2x256xf32>
    %58 = tpu.matmul %53, %1, %cst_25 {dimension_numbers = #tpu.dot_dimension_numbers<[1], [0], [0], [1], [0, 0, 1, 1], [], []>} : vector<2x64xf32>, vector<64x256xf32>, vector<2x256xf32> -> vector<2x256xf32>
    %59 = vector.extract_strided_slice %7 {offsets = [4, 0], sizes = [2, 256], strides = [1, 1]} : vector<16x256xf32> to vector<2x256xf32>
    %60 = arith.addf %59, %58 : vector<2x256xf32>
    %61 = math.tanh %60 : vector<2x256xf32>
    %cst_26 = arith.constant 5.000000e-01 : f32
    %62 = vector.broadcast %cst_26 : f32 to vector<2x256xf32>
    %63 = arith.mulf %62, %61 : vector<2x256xf32>
    %cst_27 = arith.constant 5.000000e-01 : f32
    %64 = vector.broadcast %cst_27 : f32 to vector<2x256xf32>
    %65 = arith.addf %63, %64 : vector<2x256xf32>
    %66 = vector.extract_strided_slice %65 {offsets = [0, 0], sizes = [2, 64], strides = [1, 1]} : vector<2x256xf32> to vector<2x64xf32>
    %67 = vector.extract_strided_slice %65 {offsets = [0, 64], sizes = [2, 64], strides = [1, 1]} : vector<2x256xf32> to vector<2x64xf32>
    %68 = vector.extract_strided_slice %61 {offsets = [0, 128], sizes = [2, 64], strides = [1, 1]} : vector<2x256xf32> to vector<2x64xf32>
    %69 = vector.extract_strided_slice %65 {offsets = [0, 192], sizes = [2, 64], strides = [1, 1]} : vector<2x256xf32> to vector<2x64xf32>
    %70 = arith.mulf %67, %51 : vector<2x64xf32>
    %71 = arith.mulf %66, %68 : vector<2x64xf32>
    %72 = arith.addf %70, %71 : vector<2x64xf32>
    %73 = math.tanh %72 : vector<2x64xf32>
    %74 = arith.mulf %69, %73 : vector<2x64xf32>
    %cst_28 = arith.constant dense<0.000000e+00> : vector<2x64xf32>
    %75 = tpu.matmul %74, %2, %cst_28 {dimension_numbers = #tpu.dot_dimension_numbers<[1], [0], [0], [1], [0, 0, 1, 1], [], []>} : vector<2x64xf32>, vector<64x64xf32>, vector<2x64xf32> -> vector<2x64xf32>
    %76 = vector.extract_strided_slice %13 {offsets = [2, 0], sizes = [2, 64], strides = [1, 1]} : vector<16x64xf32> to vector<2x64xf32>
    %77 = arith.addf %75, %76 : vector<2x64xf32>
    %c2 = arith.constant 2 : index
    %c0_29 = arith.constant 0 : index
    %78 = vector.load %arg8[%c2, %c0_29] : memref<16x64xf32, #tpu.memory_space<vmem>>, vector<2x64xf32>
    tpu.vector_store %arg8[%c2, %c0_29], %77 {strides = array<i32>} : memref<16x64xf32, #tpu.memory_space<vmem>>, vector<2x64xf32>,
    %cst_30 = arith.constant dense<0.000000e+00> : vector<2x256xf32>
    %79 = tpu.matmul %74, %1, %cst_30 {dimension_numbers = #tpu.dot_dimension_numbers<[1], [0], [0], [1], [0, 0, 1, 1], [], []>} : vector<2x64xf32>, vector<64x256xf32>, vector<2x256xf32> -> vector<2x256xf32>
    %80 = vector.extract_strided_slice %7 {offsets = [6, 0], sizes = [2, 256], strides = [1, 1]} : vector<16x256xf32> to vector<2x256xf32>
    %81 = arith.addf %80, %79 : vector<2x256xf32>
    %82 = math.tanh %81 : vector<2x256xf32>
    %cst_31 = arith.constant 5.000000e-01 : f32
    %83 = vector.broadcast %cst_31 : f32 to vector<2x256xf32>
    %84 = arith.mulf %83, %82 : vector<2x256xf32>
    %cst_32 = arith.constant 5.000000e-01 : f32
    %85 = vector.broadcast %cst_32 : f32 to vector<2x256xf32>
    %86 = arith.addf %84, %85 : vector<2x256xf32>
    %87 = vector.extract_strided_slice %86 {offsets = [0, 0], sizes = [2, 64], strides = [1, 1]} : vector<2x256xf32> to vector<2x64xf32>
    %88 = vector.extract_strided_slice %86 {offsets = [0, 64], sizes = [2, 64], strides = [1, 1]} : vector<2x256xf32> to vector<2x64xf32>
    %89 = vector.extract_strided_slice %82 {offsets = [0, 128], sizes = [2, 64], strides = [1, 1]} : vector<2x256xf32> to vector<2x64xf32>
    %90 = vector.extract_strided_slice %86 {offsets = [0, 192], sizes = [2, 64], strides = [1, 1]} : vector<2x256xf32> to vector<2x64xf32>
    %91 = arith.mulf %88, %72 : vector<2x64xf32>
    %92 = arith.mulf %87, %89 : vector<2x64xf32>
    %93 = arith.addf %91, %92 : vector<2x64xf32>
    %94 = math.tanh %93 : vector<2x64xf32>
    %95 = arith.mulf %90, %94 : vector<2x64xf32>
    %cst_33 = arith.constant dense<0.000000e+00> : vector<2x64xf32>
    %96 = tpu.matmul %95, %2, %cst_33 {dimension_numbers = #tpu.dot_dimension_numbers<[1], [0], [0], [1], [0, 0, 1, 1], [], []>} : vector<2x64xf32>, vector<64x64xf32>, vector<2x64xf32> -> vector<2x64xf32>
    %97 = vector.extract_strided_slice %13 {offsets = [4, 0], sizes = [2, 64], strides = [1, 1]} : vector<16x64xf32> to vector<2x64xf32>
    %98 = arith.addf %96, %97 : vector<2x64xf32>
    %c4 = arith.constant 4 : index
    %c0_34 = arith.constant 0 : index
    %99 = vector.load %arg8[%c4, %c0_34] : memref<16x64xf32, #tpu.memory_space<vmem>>, vector<2x64xf32>
    tpu.vector_store %arg8[%c4, %c0_34], %98 {strides = array<i32>} : memref<16x64xf32, #tpu.memory_space<vmem>>, vector<2x64xf32>,
    %cst_35 = arith.constant dense<0.000000e+00> : vector<2x256xf32>
    %100 = tpu.matmul %95, %1, %cst_35 {dimension_numbers = #tpu.dot_dimension_numbers<[1], [0], [0], [1], [0, 0, 1, 1], [], []>} : vector<2x64xf32>, vector<64x256xf32>, vector<2x256xf32> -> vector<2x256xf32>
    %101 = vector.extract_strided_slice %7 {offsets = [8, 0], sizes = [2, 256], strides = [1, 1]} : vector<16x256xf32> to vector<2x256xf32>
    %102 = arith.addf %101, %100 : vector<2x256xf32>
    %103 = math.tanh %102 : vector<2x256xf32>
    %cst_36 = arith.constant 5.000000e-01 : f32
    %104 = vector.broadcast %cst_36 : f32 to vector<2x256xf32>
    %105 = arith.mulf %104, %103 : vector<2x256xf32>
    %cst_37 = arith.constant 5.000000e-01 : f32
    %106 = vector.broadcast %cst_37 : f32 to vector<2x256xf32>
    %107 = arith.addf %105, %106 : vector<2x256xf32>
    %108 = vector.extract_strided_slice %107 {offsets = [0, 0], sizes = [2, 64], strides = [1, 1]} : vector<2x256xf32> to vector<2x64xf32>
    %109 = vector.extract_strided_slice %107 {offsets = [0, 64], sizes = [2, 64], strides = [1, 1]} : vector<2x256xf32> to vector<2x64xf32>
    %110 = vector.extract_strided_slice %103 {offsets = [0, 128], sizes = [2, 64], strides = [1, 1]} : vector<2x256xf32> to vector<2x64xf32>
    %111 = vector.extract_strided_slice %107 {offsets = [0, 192], sizes = [2, 64], strides = [1, 1]} : vector<2x256xf32> to vector<2x64xf32>
    %112 = arith.mulf %109, %93 : vector<2x64xf32>
    %113 = arith.mulf %108, %110 : vector<2x64xf32>
    %114 = arith.addf %112, %113 : vector<2x64xf32>
    %115 = math.tanh %114 : vector<2x64xf32>
    %116 = arith.mulf %111, %115 : vector<2x64xf32>
    %cst_38 = arith.constant dense<0.000000e+00> : vector<2x64xf32>
    %117 = tpu.matmul %116, %2, %cst_38 {dimension_numbers = #tpu.dot_dimension_numbers<[1], [0], [0], [1], [0, 0, 1, 1], [], []>} : vector<2x64xf32>, vector<64x64xf32>, vector<2x64xf32> -> vector<2x64xf32>
    %118 = vector.extract_strided_slice %13 {offsets = [6, 0], sizes = [2, 64], strides = [1, 1]} : vector<16x64xf32> to vector<2x64xf32>
    %119 = arith.addf %117, %118 : vector<2x64xf32>
    %c6 = arith.constant 6 : index
    %c0_39 = arith.constant 0 : index
    %120 = vector.load %arg8[%c6, %c0_39] : memref<16x64xf32, #tpu.memory_space<vmem>>, vector<2x64xf32>
    tpu.vector_store %arg8[%c6, %c0_39], %119 {strides = array<i32>} : memref<16x64xf32, #tpu.memory_space<vmem>>, vector<2x64xf32>,
    %cst_40 = arith.constant dense<0.000000e+00> : vector<2x256xf32>
    %121 = tpu.matmul %116, %1, %cst_40 {dimension_numbers = #tpu.dot_dimension_numbers<[1], [0], [0], [1], [0, 0, 1, 1], [], []>} : vector<2x64xf32>, vector<64x256xf32>, vector<2x256xf32> -> vector<2x256xf32>
    %122 = vector.extract_strided_slice %7 {offsets = [10, 0], sizes = [2, 256], strides = [1, 1]} : vector<16x256xf32> to vector<2x256xf32>
    %123 = arith.addf %122, %121 : vector<2x256xf32>
    %124 = math.tanh %123 : vector<2x256xf32>
    %cst_41 = arith.constant 5.000000e-01 : f32
    %125 = vector.broadcast %cst_41 : f32 to vector<2x256xf32>
    %126 = arith.mulf %125, %124 : vector<2x256xf32>
    %cst_42 = arith.constant 5.000000e-01 : f32
    %127 = vector.broadcast %cst_42 : f32 to vector<2x256xf32>
    %128 = arith.addf %126, %127 : vector<2x256xf32>
    %129 = vector.extract_strided_slice %128 {offsets = [0, 0], sizes = [2, 64], strides = [1, 1]} : vector<2x256xf32> to vector<2x64xf32>
    %130 = vector.extract_strided_slice %128 {offsets = [0, 64], sizes = [2, 64], strides = [1, 1]} : vector<2x256xf32> to vector<2x64xf32>
    %131 = vector.extract_strided_slice %124 {offsets = [0, 128], sizes = [2, 64], strides = [1, 1]} : vector<2x256xf32> to vector<2x64xf32>
    %132 = vector.extract_strided_slice %128 {offsets = [0, 192], sizes = [2, 64], strides = [1, 1]} : vector<2x256xf32> to vector<2x64xf32>
    %133 = arith.mulf %130, %114 : vector<2x64xf32>
    %134 = arith.mulf %129, %131 : vector<2x64xf32>
    %135 = arith.addf %133, %134 : vector<2x64xf32>
    %136 = math.tanh %135 : vector<2x64xf32>
    %137 = arith.mulf %132, %136 : vector<2x64xf32>
    %cst_43 = arith.constant dense<0.000000e+00> : vector<2x64xf32>
    %138 = tpu.matmul %137, %2, %cst_43 {dimension_numbers = #tpu.dot_dimension_numbers<[1], [0], [0], [1], [0, 0, 1, 1], [], []>} : vector<2x64xf32>, vector<64x64xf32>, vector<2x64xf32> -> vector<2x64xf32>
    %139 = vector.extract_strided_slice %13 {offsets = [8, 0], sizes = [2, 64], strides = [1, 1]} : vector<16x64xf32> to vector<2x64xf32>
    %140 = arith.addf %138, %139 : vector<2x64xf32>
    %c8 = arith.constant 8 : index
    %c0_44 = arith.constant 0 : index
    %141 = vector.load %arg8[%c8, %c0_44] : memref<16x64xf32, #tpu.memory_space<vmem>>, vector<2x64xf32>
    tpu.vector_store %arg8[%c8, %c0_44], %140 {strides = array<i32>} : memref<16x64xf32, #tpu.memory_space<vmem>>, vector<2x64xf32>,
    %cst_45 = arith.constant dense<0.000000e+00> : vector<2x256xf32>
    %142 = tpu.matmul %137, %1, %cst_45 {dimension_numbers = #tpu.dot_dimension_numbers<[1], [0], [0], [1], [0, 0, 1, 1], [], []>} : vector<2x64xf32>, vector<64x256xf32>, vector<2x256xf32> -> vector<2x256xf32>
    %143 = vector.extract_strided_slice %7 {offsets = [12, 0], sizes = [2, 256], strides = [1, 1]} : vector<16x256xf32> to vector<2x256xf32>
    %144 = arith.addf %143, %142 : vector<2x256xf32>
    %145 = math.tanh %144 : vector<2x256xf32>
    %cst_46 = arith.constant 5.000000e-01 : f32
    %146 = vector.broadcast %cst_46 : f32 to vector<2x256xf32>
    %147 = arith.mulf %146, %145 : vector<2x256xf32>
    %cst_47 = arith.constant 5.000000e-01 : f32
    %148 = vector.broadcast %cst_47 : f32 to vector<2x256xf32>
    %149 = arith.addf %147, %148 : vector<2x256xf32>
    %150 = vector.extract_strided_slice %149 {offsets = [0, 0], sizes = [2, 64], strides = [1, 1]} : vector<2x256xf32> to vector<2x64xf32>
    %151 = vector.extract_strided_slice %149 {offsets = [0, 64], sizes = [2, 64], strides = [1, 1]} : vector<2x256xf32> to vector<2x64xf32>
    %152 = vector.extract_strided_slice %145 {offsets = [0, 128], sizes = [2, 64], strides = [1, 1]} : vector<2x256xf32> to vector<2x64xf32>
    %153 = vector.extract_strided_slice %149 {offsets = [0, 192], sizes = [2, 64], strides = [1, 1]} : vector<2x256xf32> to vector<2x64xf32>
    %154 = arith.mulf %151, %135 : vector<2x64xf32>
    %155 = arith.mulf %150, %152 : vector<2x64xf32>
    %156 = arith.addf %154, %155 : vector<2x64xf32>
    %157 = math.tanh %156 : vector<2x64xf32>
    %158 = arith.mulf %153, %157 : vector<2x64xf32>
    %cst_48 = arith.constant dense<0.000000e+00> : vector<2x64xf32>
    %159 = tpu.matmul %158, %2, %cst_48 {dimension_numbers = #tpu.dot_dimension_numbers<[1], [0], [0], [1], [0, 0, 1, 1], [], []>} : vector<2x64xf32>, vector<64x64xf32>, vector<2x64xf32> -> vector<2x64xf32>
    %160 = vector.extract_strided_slice %13 {offsets = [10, 0], sizes = [2, 64], strides = [1, 1]} : vector<16x64xf32> to vector<2x64xf32>
    %161 = arith.addf %159, %160 : vector<2x64xf32>
    %c10 = arith.constant 10 : index
    %c0_49 = arith.constant 0 : index
    %162 = vector.load %arg8[%c10, %c0_49] : memref<16x64xf32, #tpu.memory_space<vmem>>, vector<2x64xf32>
    tpu.vector_store %arg8[%c10, %c0_49], %161 {strides = array<i32>} : memref<16x64xf32, #tpu.memory_space<vmem>>, vector<2x64xf32>,
    %cst_50 = arith.constant dense<0.000000e+00> : vector<2x256xf32>
    %163 = tpu.matmul %158, %1, %cst_50 {dimension_numbers = #tpu.dot_dimension_numbers<[1], [0], [0], [1], [0, 0, 1, 1], [], []>} : vector<2x64xf32>, vector<64x256xf32>, vector<2x256xf32> -> vector<2x256xf32>
    %164 = vector.extract_strided_slice %7 {offsets = [14, 0], sizes = [2, 256], strides = [1, 1]} : vector<16x256xf32> to vector<2x256xf32>
    %165 = arith.addf %164, %163 : vector<2x256xf32>
    %166 = math.tanh %165 : vector<2x256xf32>
    %cst_51 = arith.constant 5.000000e-01 : f32
    %167 = vector.broadcast %cst_51 : f32 to vector<2x256xf32>
    %168 = arith.mulf %167, %166 : vector<2x256xf32>
    %cst_52 = arith.constant 5.000000e-01 : f32
    %169 = vector.broadcast %cst_52 : f32 to vector<2x256xf32>
    %170 = arith.addf %168, %169 : vector<2x256xf32>
    %171 = vector.extract_strided_slice %170 {offsets = [0, 0], sizes = [2, 64], strides = [1, 1]} : vector<2x256xf32> to vector<2x64xf32>
    %172 = vector.extract_strided_slice %170 {offsets = [0, 64], sizes = [2, 64], strides = [1, 1]} : vector<2x256xf32> to vector<2x64xf32>
    %173 = vector.extract_strided_slice %166 {offsets = [0, 128], sizes = [2, 64], strides = [1, 1]} : vector<2x256xf32> to vector<2x64xf32>
    %174 = vector.extract_strided_slice %170 {offsets = [0, 192], sizes = [2, 64], strides = [1, 1]} : vector<2x256xf32> to vector<2x64xf32>
    %175 = arith.mulf %172, %156 : vector<2x64xf32>
    %176 = arith.mulf %171, %173 : vector<2x64xf32>
    %177 = arith.addf %175, %176 : vector<2x64xf32>
    %178 = math.tanh %177 : vector<2x64xf32>
    %179 = arith.mulf %174, %178 : vector<2x64xf32>
    %cst_53 = arith.constant dense<0.000000e+00> : vector<2x64xf32>
    %180 = tpu.matmul %179, %2, %cst_53 {dimension_numbers = #tpu.dot_dimension_numbers<[1], [0], [0], [1], [0, 0, 1, 1], [], []>} : vector<2x64xf32>, vector<64x64xf32>, vector<2x64xf32> -> vector<2x64xf32>
    %181 = vector.extract_strided_slice %13 {offsets = [12, 0], sizes = [2, 64], strides = [1, 1]} : vector<16x64xf32> to vector<2x64xf32>
    %182 = arith.addf %180, %181 : vector<2x64xf32>
    %c12 = arith.constant 12 : index
    %c0_54 = arith.constant 0 : index
    %183 = vector.load %arg8[%c12, %c0_54] : memref<16x64xf32, #tpu.memory_space<vmem>>, vector<2x64xf32>
    tpu.vector_store %arg8[%c12, %c0_54], %182 {strides = array<i32>} : memref<16x64xf32, #tpu.memory_space<vmem>>, vector<2x64xf32>,
    %cst_55 = arith.constant dense<0.000000e+00> : vector<2x256xf32>
    %184 = tpu.matmul %179, %1, %cst_55 {dimension_numbers = #tpu.dot_dimension_numbers<[1], [0], [0], [1], [0, 0, 1, 1], [], []>} : vector<2x64xf32>, vector<64x256xf32>, vector<2x256xf32> -> vector<2x256xf32>
    %185 = vector.broadcast %0 : vector<1x256xf32> to vector<2x256xf32>
    %186 = arith.addf %185, %184 : vector<2x256xf32>
    %187 = math.tanh %186 : vector<2x256xf32>
    %cst_56 = arith.constant 5.000000e-01 : f32
    %188 = vector.broadcast %cst_56 : f32 to vector<2x256xf32>
    %189 = arith.mulf %188, %187 : vector<2x256xf32>
    %cst_57 = arith.constant 5.000000e-01 : f32
    %190 = vector.broadcast %cst_57 : f32 to vector<2x256xf32>
    %191 = arith.addf %189, %190 : vector<2x256xf32>
    %192 = vector.extract_strided_slice %191 {offsets = [0, 0], sizes = [2, 64], strides = [1, 1]} : vector<2x256xf32> to vector<2x64xf32>
    %193 = vector.extract_strided_slice %191 {offsets = [0, 64], sizes = [2, 64], strides = [1, 1]} : vector<2x256xf32> to vector<2x64xf32>
    %194 = vector.extract_strided_slice %187 {offsets = [0, 128], sizes = [2, 64], strides = [1, 1]} : vector<2x256xf32> to vector<2x64xf32>
    %195 = vector.extract_strided_slice %191 {offsets = [0, 192], sizes = [2, 64], strides = [1, 1]} : vector<2x256xf32> to vector<2x64xf32>
    %196 = arith.mulf %193, %177 : vector<2x64xf32>
    %197 = arith.mulf %192, %194 : vector<2x64xf32>
    %198 = arith.addf %196, %197 : vector<2x64xf32>
    %199 = math.tanh %198 : vector<2x64xf32>
    %200 = arith.mulf %195, %199 : vector<2x64xf32>
    %cst_58 = arith.constant dense<0.000000e+00> : vector<2x64xf32>
    %201 = tpu.matmul %200, %2, %cst_58 {dimension_numbers = #tpu.dot_dimension_numbers<[1], [0], [0], [1], [0, 0, 1, 1], [], []>} : vector<2x64xf32>, vector<64x64xf32>, vector<2x64xf32> -> vector<2x64xf32>
    %202 = vector.extract_strided_slice %13 {offsets = [14, 0], sizes = [2, 64], strides = [1, 1]} : vector<16x64xf32> to vector<2x64xf32>
    %203 = arith.addf %201, %202 : vector<2x64xf32>
    %c14 = arith.constant 14 : index
    %c0_59 = arith.constant 0 : index
    %204 = vector.load %arg8[%c14, %c0_59] : memref<16x64xf32, #tpu.memory_space<vmem>>, vector<2x64xf32>
    tpu.vector_store %arg8[%c14, %c0_59], %203 {strides = array<i32>} : memref<16x64xf32, #tpu.memory_space<vmem>>, vector<2x64xf32>,
    return
  }
}

</mosaic_0001>

<bundles_post_ra>
// kernel: tpu_custom_call.1
= control target key start
LH: loop header
LB: loop body
LE: loop exit
PB: predicated region body
PF: predicated region fallthrough
CT: control target
= control target key end

     0   :  { %13 = vsyncpa [#allocation3], 0  ;;  %s2707_s0 = inlined_call_operand.vmem [shape: f32[16,64], index: 0, kind: input, shape index: {}]   ;;  %s2708_s1 = inlined_call_operand.vmem [shape: f32[16,4], index: 1, kind: input, shape index: {}]   ;;  %s2709_s2 = inlined_call_operand.hbm [shape: f32[64,256], index: 2, kind: input, shape index: {}]   ;;  %s2710_s3 = inlined_call_operand.vmem [shape: f32[1,256], index: 3, kind: input, shape index: {}]   ;;  %s2711_s4 = inlined_call_operand.hbm [shape: f32[64,256], index: 4, kind: input, shape index: {}]   ;;  %s2712_s5 = inlined_call_operand.hbm [shape: f32[64,64], index: 5, kind: input, shape index: {}]   ;;  %s2713_s6 = inlined_call_operand.vmem [shape: f32[4,64], index: 6, kind: input, shape index: {}]   ;;  %s2714_s7 = inlined_call_operand.vmem [shape: f32[1,64], index: 7, kind: input, shape index: {}]   ;;  %s2715_s8 = inlined_call_operand.hbm [shape: f32[16,64], index: 8, kind: output, shape index: {}]  }
   0x1   :  { %14 = vsyncpa [#allocation6], 0 }
   0x2   :  { %15 = vsyncpa [#allocation4], 0  ;;  %s2153_s27 = smov [#allocation5]   ;;  %s2154_s29 = smov [#allocation2]  }
   0x3   :  { %s39_s28 = sshll.u32 %s2153_s27, 4  ;;  %s25_s30 = sshll.u32 %s2154_s29, 4  ;;  %s40_s28 = int_to_ptr.vmem [resolvable:$true] %s39_s28  ;;  %s26_s30 = int_to_ptr.vmem [resolvable:$true] %s25_s30 }
   0x4   :  { %s2075_s9 = scalar_lea.vmem %s40_s28, 2048  ;;  %p2080_p1 = scmp.lt.s32.totalorder %s40_s28, %s40_s28 }
   0x5   :  { %p2076_p0 = scmp.ne.s32.totalorder %s40_s28, %s2075_s9  ;;  %p2081_p2 = scmp.lt.s32.totalorder %s2075_s9, %s2075_s9 }
   0x7   :  { %p2082_p3 = por %p2081_p2, %p2080_p1 }
   0x9   :  { %p2083_p4 = pnand %p2082_p3, %p2076_p0 }
   0xb   :  { %2086 = shalt.err (!%p2083_p4)
}
   0xc   :  { %s2155_s10 = smov 256   ;;  %s2156_s11 = smov 16  }
   0xd   :  { %45 = dma.hbm_to_vmem [thread:$0]  %s2711_s4, 2048, %s40_s28, [#allocation6], %s2155_s10, %s2155_s10, %s2156_s11  }
   0xe   :  { %s2095_s14 = scalar_lea.vmem %s26_s30, 2048  ;;  %p2100_p6 = scmp.lt.s32.totalorder %s26_s30, %s26_s30 }
   0xf   :  { %p2096_p5 = scmp.ne.s32.totalorder %s26_s30, %s2095_s14  ;;  %p2101_p7 = scmp.lt.s32.totalorder %s2095_s14, %s2095_s14 }
  0x11   :  { %p2102_p8 = por %p2101_p7, %p2100_p6 }
  0x13   :  { %p2103_p9 = pnand %p2102_p8, %p2096_p5 }
  0x15   :  { %2106 = shalt.err (!%p2103_p9)
}
  0x16   :  { %31 = dma.hbm_to_vmem [thread:$0]  %s2709_s2, 2048, %s26_s30, [#allocation3], %s2155_s10, %s2155_s10, %s2156_s11  }
  0x17   :  { %s2157_s17 = smov [#allocation7]  }
  0x18   :  { %s51_s18 = sshll.u32 %s2157_s17, 4  ;;  %s52_s18 = int_to_ptr.vmem [resolvable:$true] %s51_s18 }
  0x19   :  { %s2115_s19 = scalar_lea.vmem %s52_s18, 1024  ;;  %p2120_p11 = scmp.lt.s32.totalorder %s52_s18, %s52_s18 }
  0x1a   :  { %p2116_p10 = scmp.ne.s32.totalorder %s52_s18, %s2115_s19  ;;  %p2121_p12 = scmp.lt.s32.totalorder %s2115_s19, %s2115_s19 }
  0x1c   :  { %p2122_p13 = por %p2121_p12, %p2120_p11 }
  0x1e   :  { %p2123_p0 = pnand %p2122_p13, %p2116_p10 }
  0x20   :  { %2126 = shalt.err (!%p2123_p0)
}
  0x21   :  { %s2158_s4 = smov 128   ;;  %s2159_s20 = smov 8  }
  0x22   :  { %57 = dma.hbm_to_vmem [thread:$0]  %s2712_s5, 1024, %s52_s18, [#allocation6], %s2158_s4, %s2158_s4, %s2159_s20  }
  0x23   :  { %2147 = dma.done.wait [#allocation3], 2048  }
  0x24   :  { %2148 = vsyncadd [#allocation3], 4294965248 }
  0x25   :  { %2149 = dma.done.wait [#allocation6], 3072  }
  0x26   :  { %2150 = vsyncadd [#allocation6], 4294964224  ;;  %v2160_v0 = vmov 0.0   ;;  %v113_v1 = vld [vmem:[#allocation2 + $0x78] sm:$0xff]  ;;  %v112_v2 = vld [vmem:[#allocation2 + $0x70] sm:$0xff]  ;;  %vm125_vm0 = vcmask 523264   ;;  %v115_v18 = vlaneseq }
  0x27   :  { %196 = vmatprep.mubr.f32.mxu0 %v2160_v0  ;;  %v111_v3 = vld [vmem:[#allocation2 + $0x68] sm:$0xff]  ;;  %148 = vmatprep.subr.mxu0 %v113_v1  ;;  %v110_v4 = vld [vmem:[#allocation2 + $0x60] sm:$0xff]  ;;  %v109_v5 = vld [vmem:[#allocation2 + $0x58] sm:$0xff]  ;;  %vm226_vm2 = vcmask 1043456   ;;  %vm219_vm3 = vcmask 31744   ;;  %vm2162_vm4 = vmmov 0  }
  0x28   :  { %149 = vmatpush1.msra.mxu0 %v112_v2  ;;  %v108_v6 = vld [vmem:[#allocation2 + $0x50] sm:$0xff]  ;;  %v107_v7 = vld [vmem:[#allocation2 + $0x48] sm:$0xff]  ;;  %v106_v8 = vld [vmem:[#allocation2 + $0x40] sm:$0xff]  ;;  %v116_v19 = vshrl.u32 %v115_v18, 7  ;;  %v321_v31 = vand.u32 127, %v115_v18  ;;  %vm509_vm5 = vcmask 517120  }
  0x29   :  { %150 = vmatprep.subr.mxu0 %v111_v3  ;;  %v105_v9 = vld [vmem:[#allocation2 + $0x38] sm:$0xff]  ;;  %v104_v10 = vld [vmem:[#allocation2 + $0x30] sm:$0xff]  ;;  %v103_v11 = vld [vmem:[#allocation2 + $0x28] sm:$0xff] }
  0x2a   :  { %151 = vmatpush1.msra.mxu0 %v110_v4  ;;  %v102_v12 = vld [vmem:[#allocation2 + $0x20] sm:$0xff]  ;;  %v101_v13 = vld [vmem:[#allocation2 + $0x18] sm:$0xff]  ;;  %v100_v14 = vld [vmem:[#allocation2 + $0x10] sm:$0xff]  ;;  %v117_v20 = vsub.s32 0, %v116_v19  ;;  %v121_v22 = vsub.s32 1, %v116_v19  ;;  %vm322_vm1 = vcmp.lt.s32.totalorder %v321_v31, 32 }
  0x2b   :  { %152 = vmatprep.subr.mxu0 %v109_v5  ;;  %v99_v15 = vld [vmem:[#allocation2 + $0x8] sm:$0xff]  ;;  %v98_v16 = vld [vmem:[#allocation2] sm:$0xff]  ;;  %v1753_v35 = vsel %vm322_vm1, 1.0, %v2160_v0  ;;  %v2255_v39 = vld [vmem:[#allocation5 + $0x78] sm:$0xff] }
  0x2c   :  { %153 = vmatpush1.msra.mxu0 %v108_v6  ;;  %v96_v17 = vld [vmem:[%s2707_s0] sm:$0xff]  ;;  %v210_v38 = vld [vmem:[%s2708_s1 + $0x8] sm:$0xff]  ;;  %v2257_v40 = vld [vmem:[#allocation5 + $0x70] sm:$0xff] }
  0x2d   :  { %154 = vmatprep.subr.mxu0 %v107_v7  ;;  %v71_v21 = vld [vmem:[%s2710_s3] sm:$0x3]  ;;  %s2161_s3 = smov 64   ;;  %v2259_v41 = vld [vmem:[#allocation5 + $0x68] sm:$0xff]  ;;  %v2265_v43 = vld [vmem:[#allocation5 + $0x58] sm:$0xff] }
  0x2e   :  { %155 = vmatpush1.msra.mxu0 %v106_v8  ;;  %v2231_v23 = vrot.slane %v71_v21, %v117_v20  ;;  %v2233_v24 = vrot.slane %v71_v21, %v121_v22  ;;  %v211_v36 = vld [vmem:[%s2713_s6] sm:$0xf]  ;;  %v2269_v44 = vld [vmem:[#allocation5 + $0x50] sm:$0xff]  ;;  %v2272_v45 = vld [vmem:[#allocation5 + $0x48] sm:$0xff] }
  0x2f   :  { %156 = vmatprep.subr.mxu0 %v105_v9  ;;  %v209_v37 = vld [vmem:[%s2708_s1] sm:$0xff]  ;;  %1845 = vmatprep.subr.msk.mxu1 %vm226_vm2, %v211_v36  ;;  %v2278_v47 = vld [vmem:[#allocation5 + $0x38] sm:$0xff]  ;;  %v2281_v48 = vld [vmem:[#allocation5 + $0x30] sm:$0xff] }
  0x30   :  { %157 = vmatpush1.msra.mxu0 %v104_v10  ;;  %1847 = vmatprep.mubr.msk.f32.mxu1 %vm219_vm3, %v209_v37  ;;  %v2262_v42 = vld [vmem:[#allocation5 + $0x60] sm:$0xff]  ;;  %v2284_v49 = vld [vmem:[#allocation5 + $0x28] sm:$0xff]  ;;  %v2290_v51 = vld [vmem:[#allocation5 + $0x18] sm:$0xff] }
  0x31   :  { %158 = vmatprep.subr.mxu0 %v103_v11  ;;  %1846 = vmatpush3.msk.msra.mxu1 %vm226_vm2, %v211_v36  ;;  %v2275_v46 = vld [vmem:[#allocation5 + $0x40] sm:$0xff]  ;;  %v2293_v52 = vld [vmem:[#allocation5 + $0x10] sm:$0xff]  ;;  %v2296_v53 = vld [vmem:[#allocation5 + $0x8] sm:$0xff] }
  0x32   :  { %159 = vmatpush1.msra.mxu0 %v102_v12  ;;  %1848 = vmatmul.mubr.msk.f32.vlgmr.msra.gmra.mxu1 %vm219_vm3, %v210_v38  ;;  %v2287_v50 = vld [vmem:[#allocation5 + $0x20] sm:$0xff]  ;;  %v2337_v20 = vld [vmem:[#allocation7 + $0x38] sm:$0xff]  ;;  %v2339_v21 = vld [vmem:[#allocation7 + $0x30] sm:$0xff] }
  0x33   :  { %160 = vmatprep.subr.mxu0 %v101_v13  ;;  %352 = vmatprep.subr.mxu1 %v2255_v39  ;;  %v2299_v54 = vld [vmem:[#allocation5] sm:$0xff]  ;;  %v2343_v22 = vld [vmem:[#allocation7 + $0x28] sm:$0xff] }
  0x34   :  { %161 = vmatpush1.msra.mxu0 %v100_v14  ;;  %353 = vmatpush1.msra.mxu1 %v2257_v40  ;;  %v2309_v1 = vld [vmem:[%s2714_s7] ss:$0 sm:$0xff]  ;;  %v2365_v31 = vld [vmem:[#allocation7 + $0x8] sm:$0xff] }
  0x35   :  { %162 = vmatprep.subr.mxu0 %v99_v15  ;;  %400 = vmatprep.mubr.f32.mxu1 %v2160_v0 }
  0x36   :  { %163 = vmatpush1.msra.mxu0 %v98_v16  ;;  %354 = vmatprep.subr.mxu1 %v2259_v41 }
  0x37   :  { %1747 = vmatmul.mubr.msk.f32.vlgmr.msra.gmra.mxu0 %vm125_vm0, %v96_v17  ;;  %1850 = vmatprep.subr.mxu0 %v2160_v0 }
  0x38   :  { %202 = vmatprep.mubr.f32.mxu0 %v2160_v0  ;;  %355 = vmatpush1.msra.mxu1 %v2262_v42 }
  0x39   :  { %356 = vmatprep.subr.mxu1 %v2265_v43  ;;  %1851 = vmatpush3.msra.mxu0 %v2337_v20 }
  0x3a   :  { %357 = vmatpush1.msra.mxu1 %v2269_v44  ;;  %1852 = vmatprep.subr.mxu0 %v2160_v0 }
  0x3b   :  { %358 = vmatprep.subr.mxu1 %v2272_v45  ;;  %1853 = vmatpush3.msra.mxu0 %v2339_v21 }
  0x3c   :  { %359 = vmatpush1.msra.mxu1 %v2275_v46  ;;  %1854 = vmatprep.subr.mxu0 %v2160_v0 }
  0x3d   :  { %360 = vmatprep.subr.mxu1 %v2278_v47  ;;  %1855 = vmatpush3.msra.mxu0 %v2343_v22 }
  0x3e   :  { %361 = vmatpush1.msra.mxu1 %v2281_v48  ;;  %1856 = vmatprep.subr.mxu0 %v2160_v0 }
  0x3f   :  { %362 = vmatprep.subr.mxu1 %v2284_v49 }
  0x40   :  { %363 = vmatpush1.msra.mxu1 %v2287_v50 }
  0x41   :  { %364 = vmatprep.subr.mxu1 %v2290_v51 }
  0x42   :  { %365 = vmatpush1.msra.mxu1 %v2293_v52 }
  0x43   :  { %366 = vmatprep.subr.mxu1 %v2296_v53 }
  0x44   :  { %367 = vmatpush1.msra.mxu1 %v2299_v54 }
  0x45   :  { %527 = vmatprep.subr.mxu1 %v2255_v39 }
  0xf2   :  { %v1849_v2 = vpop.f32.mrf.mxu1 }
  0xf3   :  { %v2312_v3 = vadd.f32 %v1849_v2, %v2309_v1 }
  0xf4   :  { %v2332_v5 = vpop.f32.mrf.mxu1 }
  0xf7   :  { %v198_v25 = vpop.f32.mrf.mxu0 }
  0xf8   :  { %v2236_v26 = vadd.f32 %v198_v25, %v2231_v23  ;;  %v97_v25 = vld [vmem:[%s2707_s0 + $0x8] sm:$0xff]  ;;  %s2163_s0 = smov [#allocation8]  }
  0xf9   :  { %v200_v27 = vpop.f32.mrf.mxu0  ;;  %1748 = vmatmul.mubr.msk.f32.gmra.mxu0 %vm125_vm0, %v97_v25  ;;  %s1734_s10 = sshll.u32 %s2163_s0, 4  ;;  %s1735_s10 = int_to_ptr.vmem [resolvable:$true] %s1734_s10 }
  0xfa   :  { %v2239_v28 = vadd.f32 %v200_v27, %v2233_v24  ;;  %2013 = vtanh.f32 %v2236_v26  ;;  %v2350_v27 = vld [vmem:[#allocation7 + $0x20] sm:$0xff]  ;;  %1866 = vmatprep.mubr.msk.f32.mxu0 %vm2162_vm4, %v2160_v0  ;;  %s2127_s11 = scalar_lea.vmem %s1735_s10, 256  ;;  %p2132_p2 = scmp.lt.s32.totalorder %s1735_s10, %s1735_s10 }
  0xfb   :  { %1857 = vmatpush3.msra.mxu0 %v2350_v27  ;;  %p2128_p1 = scmp.ne.s32.totalorder %s1735_s10, %s2127_s11  ;;  %p2133_p3 = scmp.lt.s32.totalorder %s2127_s11, %s2127_s11 }
  0xfc   :  { %2015 = vtanh.f32 %v2239_v28  ;;  %1858 = vmatprep.subr.mxu0 %v2160_v0 }
  0xfd   :  { %p2134_p4 = por %p2133_p3, %p2132_p2 }
  0xff   :  { %p2135_p5 = pnand %p2134_p4, %p2128_p1 }
 0x107   :  { %v2014_v29 = vpop.eup %2013 }
 0x108   :  { %v307_v30 = vmul.f32 0.5, %v2014_v29  ;;  %v2357_v29 = vld [vmem:[#allocation7 + $0x18] sm:$0xff] }
 0x109   :  { %v2016_v33 = vpop.eup %2015  ;;  %1859 = vmatpush3.msra.mxu0 %v2357_v29 }
 0x10a   :  { %v309_v32 = vadd.f32 0.5, %v307_v30  ;;  %v308_v58 = vmul.f32 0.5, %v2016_v33  ;;  %v2361_v30 = vld [vmem:[#allocation7 + $0x10] sm:$0xff]  ;;  %1860 = vmatprep.subr.mxu0 %v2160_v0 }
 0x10b   :  { %1861 = vmatpush3.msra.mxu0 %v2361_v30 }
 0x10c   :  { %v312_v34 = vmul.f32 %v2016_v33, %v309_v32  ;;  %v311_v55 = vmul.f32 0.0, %v309_v32  ;;  %v310_v59 = vadd.f32 0.5, %v308_v58  ;;  %1862 = vmatprep.subr.mxu0 %v2160_v0  ;;  %v2369_v32 = vld [vmem:[#allocation7] sm:$0xff] }
 0x10d   :  { %1863 = vmatpush3.msra.mxu0 %v2365_v31 }
 0x10e   :  { %314 = vrot.lane.b32.xlu0 %v312_v34, %s2161_s3  ;;  %1864 = vmatprep.subr.mxu0 %v2160_v0 }
 0x10f   :  { %1865 = vmatpush3.msra.mxu0 %v2369_v32 }
 0x110   :  { %1869 = vmatprep.subr.mxu0 %v2160_v0 }
 0x112   :  { %326 = vrot.lane.b32.xlu0 %v1753_v35, %s2161_s3 }
 0x180   :  { %v315_v56 = vpop.permute.xlu0 %314 }
 0x181   :  { %v317_v57 = vadd.f32 %v315_v56, %v311_v55 }
 0x183   :  { %2017 = vtanh.f32 %v317_v57 }
 0x184   :  { %v327_v62 = vpop.permute.xlu0 %326 }
 0x185   :  { %v330_v12 = vmul.f32 %v327_v62, %v317_v57 }
 0x187   :  { %v422_v15 = vrot.slane %v330_v12, 6 }
 0x190   :  { %v2018_v60 = vpop.eup %2017 }
 0x191   :  { %v319_v61 = vmul.f32 %v2018_v60, %v310_v59  ;;  %v2422_v59 = vadd.f32 %v2309_v1, %v2332_v5 }
 0x193   :  { %v329_v63 = vmul.f32 %v327_v62, %v319_v61 }
 0x195   :  { %332 = vrot.lane.b32.xlu1 %v329_v63, %s2161_s3 }
 0x1b9   :  { %v2416_v57 = vpop.f32.mrf.mxu0 }
 0x1bb   :  { %v2418_v58 = vpop.f32.mrf.mxu0 }
 0x207   :  { %v333_v4 = vpop.permute.xlu1 %332 }
 0x208   :  { %1754 = vmatmul.mubr.msk.f32.vlgmr.msra.gmra.mxu1 %vm125_vm0, %v333_v4 }
 0x209   :  { %528 = vmatpush1.msra.mxu1 %v2257_v40  ;;  %575 = vmatprep.mubr.f32.mxu1 %v2160_v0 }
 0x20a   :  { %529 = vmatprep.subr.mxu1 %v2259_v41 }
 0x20b   :  { %530 = vmatpush1.msra.mxu1 %v2262_v42 }
 0x20c   :  { %531 = vmatprep.subr.mxu1 %v2265_v43 }
 0x20d   :  { %532 = vmatpush1.msra.mxu1 %v2269_v44 }
 0x20e   :  { %533 = vmatprep.subr.mxu1 %v2272_v45 }
 0x20f   :  { %534 = vmatpush1.msra.mxu1 %v2275_v46 }
 0x210   :  { %535 = vmatprep.subr.mxu1 %v2278_v47 }
 0x211   :  { %536 = vmatpush1.msra.mxu1 %v2281_v48 }
 0x212   :  { %537 = vmatprep.subr.mxu1 %v2284_v49 }
 0x213   :  { %538 = vmatpush1.msra.mxu1 %v2287_v50 }
 0x214   :  { %539 = vmatprep.subr.mxu1 %v2290_v51 }
 0x215   :  { %540 = vmatpush1.msra.mxu1 %v2293_v52 }
 0x216   :  { %541 = vmatprep.subr.mxu1 %v2296_v53 }
 0x217   :  { %542 = vmatpush1.msra.mxu1 %v2299_v54 }
 0x218   :  { %704 = vmatprep.subr.mxu1 %v2255_v39 }
 0x2c8   :  { %v402_v6 = vpop.f32.mrf.mxu1 }
 0x2c9   :  { %v409_v7 = vrot.slane %v402_v6, 6 }
 0x2ca   :  { %v404_v8 = vpop.f32.mrf.mxu1 }
 0x2cb   :  { %v413_v9 = vadd.f32 %v409_v7, %v2236_v26  ;;  %v410_v10 = vrot.slane %v404_v8, 6 }
 0x2cd   :  { %2019 = vtanh.f32 %v413_v9  ;;  %v414_v11 = vadd.f32 %v410_v10, %v2239_v28 }
 0x2cf   :  { %2021 = vtanh.f32 %v414_v11 }
 0x2da   :  { %v2020_v13 = vpop.eup %2019 }
 0x2db   :  { %v417_v14 = vmul.f32 0.5, %v2020_v13 }
 0x2dc   :  { %v2022_v17 = vpop.eup %2021 }
 0x2dd   :  { %v419_v16 = vadd.f32 0.5, %v417_v14  ;;  %v418_v35 = vmul.f32 0.5, %v2022_v17 }
 0x2df   :  { %v425_v18 = vmul.f32 %v2022_v17, %v419_v16  ;;  %v424_v19 = vmul.f32 %v422_v15, %v419_v16  ;;  %v420_v36 = vadd.f32 0.5, %v418_v35 }
 0x2e1   :  { %427 = vrot.lane.b32.xlu1 %v425_v18, %s2161_s3 }
 0x353   :  { %v428_v33 = vpop.permute.xlu1 %427 }
 0x354   :  { %v2375_v34 = vadd.f32 %v428_v33, %v424_v19 }
 0x356   :  { %2023 = vtanh.f32 %v2375_v34  ;;  %v597_v5 = vrot.slane %v2375_v34, 6  ;;  %v613_v34 = vrot.slane %v2422_v59, 2 }
 0x363   :  { %v2024_v37 = vpop.eup %2023 }
 0x364   :  { %v432_v38 = vmul.f32 %v2024_v37, %v420_v36 }
 0x366   :  { %v434_v55 = vrot.slane %v432_v38, 2 }
 0x368   :  { %435 = vrot.lane.b32.xlu0 %v434_v55, %s2161_s3 }
 0x3da   :  { %v436_v56 = vpop.permute.xlu0 %435 }
 0x3db   :  { %1867 = vmatmul.mubr.msk.f32.vlgmr.msra.gmra.mxu0 %vm125_vm0, %v436_v56  ;;  %1756 = vmatmul.mubr.msk.f32.vlgmr.msra.gmra.mxu1 %vm125_vm0, %v436_v56 }
 0x3dc   :  { %1870 = vmatpush3.msra.mxu0 %v2337_v20  ;;  %705 = vmatpush1.msra.mxu1 %v2257_v40 }
 0x3dd   :  { %1871 = vmatprep.subr.mxu0 %v2160_v0  ;;  %706 = vmatprep.subr.mxu1 %v2259_v41 }
 0x3de   :  { %1872 = vmatpush3.msra.mxu0 %v2339_v21  ;;  %707 = vmatpush1.msra.mxu1 %v2262_v42 }
 0x3df   :  { %1873 = vmatprep.subr.mxu0 %v2160_v0  ;;  %708 = vmatprep.subr.mxu1 %v2265_v43 }
 0x3e0   :  { %1874 = vmatpush3.msra.mxu0 %v2343_v22  ;;  %709 = vmatpush1.msra.mxu1 %v2269_v44 }
 0x3e1   :  { %1875 = vmatprep.subr.mxu0 %v2160_v0  ;;  %710 = vmatprep.subr.mxu1 %v2272_v45 }
 0x3e2   :  { %1876 = vmatpush3.msra.mxu0 %v2350_v27  ;;  %711 = vmatpush1.msra.mxu1 %v2275_v46 }
 0x3e3   :  { %1877 = vmatprep.subr.mxu0 %v2160_v0  ;;  %712 = vmatprep.subr.mxu1 %v2278_v47 }
 0x3e4   :  { %1878 = vmatpush3.msra.mxu0 %v2357_v29  ;;  %713 = vmatpush1.msra.mxu1 %v2281_v48 }
 0x3e5   :  { %1879 = vmatprep.subr.mxu0 %v2160_v0  ;;  %714 = vmatprep.subr.mxu1 %v2284_v49 }
 0x3e6   :  { %1880 = vmatpush3.msra.mxu0 %v2361_v30  ;;  %715 = vmatpush1.msra.mxu1 %v2287_v50 }
 0x3e7   :  { %1881 = vmatprep.subr.mxu0 %v2160_v0  ;;  %716 = vmatprep.subr.mxu1 %v2290_v51 }
 0x3e8   :  { %1882 = vmatpush3.msra.mxu0 %v2365_v31  ;;  %717 = vmatpush1.msra.mxu1 %v2293_v52 }
 0x3e9   :  { %1883 = vmatprep.subr.mxu0 %v2160_v0  ;;  %718 = vmatprep.subr.mxu1 %v2296_v53 }
 0x3ea   :  { %1884 = vmatpush3.msra.mxu0 %v2369_v32  ;;  %1885 = vmatprep.mubr.msk.f32.mxu0 %vm2162_vm4, %v2160_v0 }
 0x3eb   :  { %719 = vmatpush1.msra.mxu1 %v2299_v54  ;;  %752 = vmatprep.mubr.f32.mxu1 %v2160_v0 }
 0x3ec   :  { %1888 = vmatprep.subr.mxu0 %v2160_v0  ;;  %880 = vmatprep.subr.mxu1 %v2255_v39 }
 0x49b   :  { %v505_v60 = vpop.f32.mrf.mxu0  ;;  %v577_v61 = vpop.f32.mrf.mxu1 }
 0x49c   :  { %v506_v62 = vadd.f32 %v505_v60, %v2422_v59  ;;  %v584_v63 = vrot.slane %v577_v61, 4 }
 0x49d   :  { %v1868_v2 = vpop.f32.mrf.mxu0  ;;  %v579_v4 = vpop.f32.mrf.mxu1 }
 0x49e   :  { %510 = vst.msk [vmem:[#allocation8] sm:$0x3] %vm509_vm5, %v506_v62  ;;  %v588_v6 = vadd.f32 %v584_v63, %v2236_v26  ;;  %v585_v7 = vrot.slane %v579_v4, 4 }
 0x4a0   :  { %2025 = vtanh.f32 %v588_v6  ;;  %v589_v8 = vadd.f32 %v585_v7, %v2239_v28 }
 0x4a2   :  { %2027 = vtanh.f32 %v589_v8 }
 0x4ad   :  { %v2026_v9 = vpop.eup %2025 }
 0x4ae   :  { %v592_v1 = vmul.f32 0.5, %v2026_v9 }
 0x4af   :  { %v2028_v11 = vpop.eup %2027 }
 0x4b0   :  { %v594_v10 = vadd.f32 0.5, %v592_v1  ;;  %v593_v16 = vmul.f32 0.5, %v2028_v11 }
 0x4b2   :  { %v600_v12 = vmul.f32 %v2028_v11, %v594_v10  ;;  %v599_v13 = vmul.f32 %v597_v5, %v594_v10  ;;  %v595_v17 = vadd.f32 0.5, %v593_v16 }
 0x4b4   :  { %602 = vrot.lane.b32.xlu1 %v600_v12, %s2161_s3 }
 0x526   :  { %v603_v14 = vpop.permute.xlu1 %602 }
 0x527   :  { %v2430_v15 = vadd.f32 %v603_v14, %v599_v13  ;;  %v2520_v14 = vadd.f32 %v2416_v57, %v2231_v23 }
 0x529   :  { %2029 = vtanh.f32 %v2430_v15  ;;  %v774_v4 = vrot.slane %v2430_v15, 6  ;;  %v789_v15 = vrot.slane %v2422_v59, 4 }
 0x536   :  { %v2030_v18 = vpop.eup %2029 }
 0x537   :  { %v607_v19 = vmul.f32 %v2030_v18, %v595_v17  ;;  %v2525_v18 = vadd.f32 %v2418_v58, %v2233_v24 }
 0x539   :  { %v609_v25 = vrot.slane %v607_v19, 4 }
 0x53b   :  { %610 = vrot.lane.b32.xlu0 %v609_v25, %s2161_s3 }
 0x5ad   :  { %v611_v33 = vpop.permute.xlu0 %610 }
 0x5ae   :  { %1886 = vmatmul.mubr.msk.f32.vlgmr.msra.gmra.mxu0 %vm125_vm0, %v611_v33  ;;  %1758 = vmatmul.mubr.msk.f32.vlgmr.msra.gmra.mxu1 %vm125_vm0, %v611_v33 }
 0x5af   :  { %1889 = vmatpush3.msra.mxu0 %v2337_v20  ;;  %881 = vmatpush1.msra.mxu1 %v2257_v40 }
 0x5b0   :  { %1890 = vmatprep.subr.mxu0 %v2160_v0  ;;  %882 = vmatprep.subr.mxu1 %v2259_v41 }
 0x5b1   :  { %1891 = vmatpush3.msra.mxu0 %v2339_v21  ;;  %883 = vmatpush1.msra.mxu1 %v2262_v42 }
 0x5b2   :  { %1892 = vmatprep.subr.mxu0 %v2160_v0  ;;  %884 = vmatprep.subr.mxu1 %v2265_v43 }
 0x5b3   :  { %1893 = vmatpush3.msra.mxu0 %v2343_v22  ;;  %885 = vmatpush1.msra.mxu1 %v2269_v44 }
 0x5b4   :  { %1894 = vmatprep.subr.mxu0 %v2160_v0  ;;  %886 = vmatprep.subr.mxu1 %v2272_v45 }
 0x5b5   :  { %1895 = vmatpush3.msra.mxu0 %v2350_v27  ;;  %887 = vmatpush1.msra.mxu1 %v2275_v46 }
 0x5b6   :  { %1896 = vmatprep.subr.mxu0 %v2160_v0  ;;  %888 = vmatprep.subr.mxu1 %v2278_v47 }
 0x5b7   :  { %1897 = vmatpush3.msra.mxu0 %v2357_v29  ;;  %889 = vmatpush1.msra.mxu1 %v2281_v48 }
 0x5b8   :  { %1898 = vmatprep.subr.mxu0 %v2160_v0  ;;  %890 = vmatprep.subr.mxu1 %v2284_v49 }
 0x5b9   :  { %1899 = vmatpush3.msra.mxu0 %v2361_v30  ;;  %891 = vmatpush1.msra.mxu1 %v2287_v50 }
 0x5ba   :  { %1900 = vmatprep.subr.mxu0 %v2160_v0  ;;  %892 = vmatprep.subr.mxu1 %v2290_v51 }
 0x5bb   :  { %1901 = vmatpush3.msra.mxu0 %v2365_v31  ;;  %893 = vmatpush1.msra.mxu1 %v2293_v52 }
 0x5bc   :  { %1902 = vmatprep.subr.mxu0 %v2160_v0  ;;  %894 = vmatprep.subr.mxu1 %v2296_v53 }
 0x5bd   :  { %1903 = vmatpush3.msra.mxu0 %v2369_v32  ;;  %1904 = vmatprep.mubr.msk.f32.mxu0 %vm2162_vm4, %v2160_v0 }
 0x5be   :  { %895 = vmatpush1.msra.mxu1 %v2299_v54  ;;  %928 = vmatprep.mubr.f32.mxu1 %v2160_v0 }
 0x5bf   :  { %1907 = vmatprep.subr.mxu0 %v2160_v0  ;;  %1049 = vmatprep.subr.mxu1 %v2255_v39 }
 0x66e   :  { %v683_v35 = vpop.f32.mrf.mxu0  ;;  %v754_v36 = vpop.f32.mrf.mxu1 }
 0x66f   :  { %v684_v37 = vadd.f32 %v683_v35, %v613_v34  ;;  %v761_v38 = vrot.slane %v754_v36, 2 }
 0x670   :  { %v1887_v55 = vpop.f32.mrf.mxu0  ;;  %v756_v56 = vpop.f32.mrf.mxu1 }
 0x671   :  { %687 = vst.msk [vmem:[#allocation8 + $0x2] sm:$0x3] %vm509_vm5, %v684_v37  ;;  %v765_v60 = vadd.f32 %v761_v38, %v2236_v26  ;;  %v762_v61 = vrot.slane %v756_v56, 2 }
 0x673   :  { %2031 = vtanh.f32 %v765_v60  ;;  %v766_v62 = vadd.f32 %v762_v61, %v2239_v28 }
 0x675   :  { %2033 = vtanh.f32 %v766_v62 }
 0x680   :  { %v2032_v63 = vpop.eup %2031 }
 0x681   :  { %v769_v2 = vmul.f32 0.5, %v2032_v63 }
 0x682   :  { %v2034_v7 = vpop.eup %2033 }
 0x683   :  { %v771_v6 = vadd.f32 0.5, %v769_v2  ;;  %v770_v26 = vmul.f32 0.5, %v2034_v7 }
 0x685   :  { %v777_v8 = vmul.f32 %v2034_v7, %v771_v6  ;;  %v776_v9 = vmul.f32 %v774_v4, %v771_v6  ;;  %v772_v10 = vadd.f32 0.5, %v770_v26  ;;  %v958_v7 = vrot.slane %v2422_v59, 6 }
 0x687   :  { %779 = vrot.lane.b32.xlu1 %v777_v8, %s2161_s3 }
 0x6f9   :  { %v780_v1 = vpop.permute.xlu1 %779 }
 0x6fa   :  { %v2477_v5 = vadd.f32 %v780_v1, %v776_v9 }
 0x6fc   :  { %2035 = vtanh.f32 %v2477_v5  ;;  %v944_v37 = vrot.slane %v2477_v5, 6 }
 0x709   :  { %v2036_v11 = vpop.eup %2035 }
 0x70a   :  { %v784_v28 = vmul.f32 %v2036_v11, %v772_v10 }
 0x70c   :  { %v786_v12 = vrot.slane %v784_v28, 6 }
 0x70e   :  { %787 = vrot.lane.b32.xlu0 %v786_v12, %s2161_s3 }
 0x780   :  { %v788_v13 = vpop.permute.xlu0 %787 }
 0x781   :  { %1905 = vmatmul.mubr.msk.f32.vlgmr.msra.gmra.mxu0 %vm125_vm0, %v788_v13  ;;  %1760 = vmatmul.mubr.msk.f32.vlgmr.msra.gmra.mxu1 %vm125_vm0, %v788_v13 }
 0x782   :  { %1908 = vmatpush3.msra.mxu0 %v2337_v20  ;;  %1050 = vmatpush1.msra.mxu1 %v2257_v40 }
 0x783   :  { %1909 = vmatprep.subr.mxu0 %v2160_v0  ;;  %1051 = vmatprep.subr.mxu1 %v2259_v41 }
 0x784   :  { %1910 = vmatpush3.msra.mxu0 %v2339_v21  ;;  %1052 = vmatpush1.msra.mxu1 %v2262_v42 }
 0x785   :  { %1911 = vmatprep.subr.mxu0 %v2160_v0  ;;  %1053 = vmatprep.subr.mxu1 %v2265_v43 }
 0x786   :  { %1912 = vmatpush3.msra.mxu0 %v2343_v22  ;;  %1054 = vmatpush1.msra.mxu1 %v2269_v44 }
 0x787   :  { %1913 = vmatprep.subr.mxu0 %v2160_v0  ;;  %1055 = vmatprep.subr.mxu1 %v2272_v45 }
 0x788   :  { %1914 = vmatpush3.msra.mxu0 %v2350_v27  ;;  %1056 = vmatpush1.msra.mxu1 %v2275_v46 }
 0x789   :  { %1915 = vmatprep.subr.mxu0 %v2160_v0  ;;  %1057 = vmatprep.subr.mxu1 %v2278_v47 }
 0x78a   :  { %1916 = vmatpush3.msra.mxu0 %v2357_v29  ;;  %1058 = vmatpush1.msra.mxu1 %v2281_v48 }
 0x78b   :  { %1917 = vmatprep.subr.mxu0 %v2160_v0  ;;  %1059 = vmatprep.subr.mxu1 %v2284_v49 }
 0x78c   :  { %1918 = vmatpush3.msra.mxu0 %v2361_v30  ;;  %1060 = vmatpush1.msra.mxu1 %v2287_v50 }
 0x78d   :  { %1919 = vmatprep.subr.mxu0 %v2160_v0  ;;  %1061 = vmatprep.subr.mxu1 %v2290_v51 }
 0x78e   :  { %1920 = vmatpush3.msra.mxu0 %v2365_v31  ;;  %1062 = vmatpush1.msra.mxu1 %v2293_v52 }
 0x78f   :  { %1921 = vmatprep.subr.mxu0 %v2160_v0  ;;  %1063 = vmatprep.subr.mxu1 %v2296_v53 }
 0x790   :  { %1922 = vmatpush3.msra.mxu0 %v2369_v32  ;;  %1923 = vmatprep.mubr.msk.f32.mxu0 %vm2162_vm4, %v2160_v0 }
 0x791   :  { %1064 = vmatpush1.msra.mxu1 %v2299_v54  ;;  %1097 = vmatprep.mubr.f32.mxu1 %v2160_v0 }
 0x792   :  { %1926 = vmatprep.subr.mxu0 %v2160_v0  ;;  %1223 = vmatprep.subr.mxu1 %v2255_v39 }
 0x841   :  { %v859_v16 = vpop.f32.mrf.mxu0  ;;  %v930_v17 = vpop.f32.mrf.mxu1 }
 0x842   :  { %v860_v19 = vadd.f32 %v859_v16, %v789_v15  ;;  %v935_v25 = vadd.f32 %v930_v17, %v2520_v14 }
 0x843   :  { %v1906_v33 = vpop.f32.mrf.mxu0  ;;  %v932_v34 = vpop.f32.mrf.mxu1 }
 0x844   :  { %863 = vst.msk [vmem:[#allocation8 + $0x4] sm:$0x3] %vm509_vm5, %v860_v19  ;;  %2037 = vtanh.f32 %v935_v25  ;;  %v936_v35 = vadd.f32 %v932_v34, %v2525_v18 }
 0x846   :  { %2039 = vtanh.f32 %v936_v35 }
 0x851   :  { %v2038_v57 = vpop.eup %2037 }
 0x852   :  { %v939_v36 = vmul.f32 0.5, %v2038_v57 }
 0x853   :  { %v2040_v55 = vpop.eup %2039 }
 0x854   :  { %v941_v38 = vadd.f32 0.5, %v939_v36  ;;  %v940_v62 = vmul.f32 0.5, %v2040_v55 }
 0x856   :  { %v947_v56 = vmul.f32 %v2040_v55, %v941_v38  ;;  %v946_v58 = vmul.f32 %v944_v37, %v941_v38  ;;  %v942_v63 = vadd.f32 0.5, %v940_v62 }
 0x858   :  { %949 = vrot.lane.b32.xlu1 %v947_v56, %s2161_s3 }
 0x8ca   :  { %v950_v60 = vpop.permute.xlu1 %949 }
 0x8cb   :  { %v2532_v61 = vadd.f32 %v950_v60, %v946_v58 }
 0x8cd   :  { %2041 = vtanh.f32 %v2532_v61  ;;  %v1119_v16 = vrot.slane %v2532_v61, 6 }
 0x8da   :  { %v2042_v2 = vpop.eup %2041 }
 0x8db   :  { %v954_v4 = vmul.f32 %v2042_v2, %v942_v63 }
 0x8dd   :  { %956 = vrot.lane.b32.xlu0 %v954_v4, %s2161_s3 }
 0x94f   :  { %v957_v6 = vpop.permute.xlu0 %956 }
 0x950   :  { %1924 = vmatmul.mubr.msk.f32.vlgmr.msra.gmra.mxu0 %vm125_vm0, %v957_v6  ;;  %1762 = vmatmul.mubr.msk.f32.vlgmr.msra.gmra.mxu1 %vm125_vm0, %v957_v6 }
 0x951   :  { %1927 = vmatpush3.msra.mxu0 %v2337_v20  ;;  %1224 = vmatpush1.msra.mxu1 %v2257_v40 }
 0x952   :  { %1928 = vmatprep.subr.mxu0 %v2160_v0  ;;  %1225 = vmatprep.subr.mxu1 %v2259_v41 }
 0x953   :  { %1929 = vmatpush3.msra.mxu0 %v2339_v21  ;;  %1226 = vmatpush1.msra.mxu1 %v2262_v42 }
 0x954   :  { %1930 = vmatprep.subr.mxu0 %v2160_v0  ;;  %1227 = vmatprep.subr.mxu1 %v2265_v43 }
 0x955   :  { %1931 = vmatpush3.msra.mxu0 %v2343_v22  ;;  %1228 = vmatpush1.msra.mxu1 %v2269_v44 }
 0x956   :  { %1932 = vmatprep.subr.mxu0 %v2160_v0  ;;  %1229 = vmatprep.subr.mxu1 %v2272_v45 }
 0x957   :  { %1933 = vmatpush3.msra.mxu0 %v2350_v27  ;;  %1230 = vmatpush1.msra.mxu1 %v2275_v46 }
 0x958   :  { %1934 = vmatprep.subr.mxu0 %v2160_v0  ;;  %1231 = vmatprep.subr.mxu1 %v2278_v47 }
 0x959   :  { %1935 = vmatpush3.msra.mxu0 %v2357_v29  ;;  %1232 = vmatpush1.msra.mxu1 %v2281_v48 }
 0x95a   :  { %1936 = vmatprep.subr.mxu0 %v2160_v0  ;;  %1233 = vmatprep.subr.mxu1 %v2284_v49 }
 0x95b   :  { %1937 = vmatpush3.msra.mxu0 %v2361_v30  ;;  %1234 = vmatpush1.msra.mxu1 %v2287_v50 }
 0x95c   :  { %1938 = vmatprep.subr.mxu0 %v2160_v0  ;;  %1235 = vmatprep.subr.mxu1 %v2290_v51 }
 0x95d   :  { %1939 = vmatpush3.msra.mxu0 %v2365_v31  ;;  %1236 = vmatpush1.msra.mxu1 %v2293_v52 }
 0x95e   :  { %1940 = vmatprep.subr.mxu0 %v2160_v0  ;;  %1237 = vmatprep.subr.mxu1 %v2296_v53 }
 0x95f   :  { %1941 = vmatpush3.msra.mxu0 %v2369_v32  ;;  %1942 = vmatprep.mubr.msk.f32.mxu0 %vm2162_vm4, %v2160_v0 }
 0x960   :  { %1238 = vmatpush1.msra.mxu1 %v2299_v54  ;;  %1271 = vmatprep.mubr.f32.mxu1 %v2160_v0 }
 0x961   :  { %1945 = vmatprep.subr.mxu0 %v2160_v0  ;;  %1400 = vmatprep.subr.mxu1 %v2255_v39 }
 0xa10   :  { %v1028_v8 = vpop.f32.mrf.mxu0  ;;  %v1099_v9 = vpop.f32.mrf.mxu1 }
 0xa11   :  { %v1029_v1 = vadd.f32 %v1028_v8, %v958_v7  ;;  %v1106_v5 = vrot.slane %v1099_v9, 6 }
 0xa12   :  { %v1925_v26 = vpop.f32.mrf.mxu0  ;;  %v1101_v10 = vpop.f32.mrf.mxu1 }
 0xa13   :  { %1032 = vst.msk [vmem:[#allocation8 + $0x6] sm:$0x3] %vm509_vm5, %v1029_v1  ;;  %v1110_v11 = vadd.f32 %v1106_v5, %v2520_v14  ;;  %v1107_v28 = vrot.slane %v1101_v10, 6 }
 0xa15   :  { %2043 = vtanh.f32 %v1110_v11  ;;  %v1111_v12 = vadd.f32 %v1107_v28, %v2525_v18 }
 0xa17   :  { %2045 = vtanh.f32 %v1111_v12 }
 0xa22   :  { %v2044_v13 = vpop.eup %2043 }
 0xa23   :  { %v1114_v15 = vmul.f32 0.5, %v2044_v13 }
 0xa24   :  { %v2046_v17 = vpop.eup %2045 }
 0xa25   :  { %v1116_v59 = vadd.f32 0.5, %v1114_v15  ;;  %v1115_v35 = vmul.f32 0.5, %v2046_v17 }
 0xa27   :  { %v1122_v19 = vmul.f32 %v2046_v17, %v1116_v59  ;;  %v1121_v25 = vmul.f32 %v1119_v16, %v1116_v59  ;;  %v1117_v57 = vadd.f32 0.5, %v1115_v35 }
 0xa29   :  { %1124 = vrot.lane.b32.xlu1 %v1122_v19, %s2161_s3 }
 0xa9b   :  { %v1125_v33 = vpop.permute.xlu1 %1124 }
 0xa9c   :  { %v2579_v34 = vadd.f32 %v1125_v33, %v1121_v25 }
 0xa9e   :  { %2047 = vtanh.f32 %v2579_v34 }
 0xaab   :  { %v2048_v36 = vpop.eup %2047 }
 0xaac   :  { %v1129_v37 = vmul.f32 %v2048_v36, %v1117_v57 }
 0xaae   :  { %v1131_v38 = vrot.slane %v1129_v37, 2 }
 0xab0   :  { %1132 = vrot.lane.b32.xlu0 %v1131_v38, %s2161_s3 }
 0xb22   :  { %v1133_v55 = vpop.permute.xlu0 %1132 }
 0xb23   :  { %1943 = vmatmul.mubr.msk.f32.vlgmr.msra.gmra.mxu0 %vm125_vm0, %v1133_v55  ;;  %1764 = vmatmul.mubr.msk.f32.vlgmr.msra.gmra.mxu1 %vm125_vm0, %v1133_v55 }
 0xb24   :  { %1946 = vmatpush3.msra.mxu0 %v2337_v20  ;;  %1401 = vmatpush1.msra.mxu1 %v2257_v40 }
 0xb25   :  { %1947 = vmatprep.subr.mxu0 %v2160_v0  ;;  %1402 = vmatprep.subr.mxu1 %v2259_v41 }
 0xb26   :  { %1948 = vmatpush3.msra.mxu0 %v2339_v21  ;;  %1403 = vmatpush1.msra.mxu1 %v2262_v42 }
 0xb27   :  { %1949 = vmatprep.subr.mxu0 %v2160_v0  ;;  %1404 = vmatprep.subr.mxu1 %v2265_v43 }
 0xb28   :  { %1950 = vmatpush3.msra.mxu0 %v2343_v22  ;;  %1405 = vmatpush1.msra.mxu1 %v2269_v44 }
 0xb29   :  { %1951 = vmatprep.subr.mxu0 %v2160_v0  ;;  %1406 = vmatprep.subr.mxu1 %v2272_v45 }
 0xb2a   :  { %1952 = vmatpush3.msra.mxu0 %v2350_v27  ;;  %1407 = vmatpush1.msra.mxu1 %v2275_v46 }
 0xb2b   :  { %1953 = vmatprep.subr.mxu0 %v2160_v0  ;;  %1408 = vmatprep.subr.mxu1 %v2278_v47 }
 0xb2c   :  { %1954 = vmatpush3.msra.mxu0 %v2357_v29  ;;  %1409 = vmatpush1.msra.mxu1 %v2281_v48 }
 0xb2d   :  { %1955 = vmatprep.subr.mxu0 %v2160_v0  ;;  %1410 = vmatprep.subr.mxu1 %v2284_v49 }
 0xb2e   :  { %1956 = vmatpush3.msra.mxu0 %v2361_v30  ;;  %1411 = vmatpush1.msra.mxu1 %v2287_v50 }
 0xb2f   :  { %1957 = vmatprep.subr.mxu0 %v2160_v0  ;;  %1412 = vmatprep.subr.mxu1 %v2290_v51 }
 0xb30   :  { %1958 = vmatpush3.msra.mxu0 %v2365_v31  ;;  %1413 = vmatpush1.msra.mxu1 %v2293_v52 }
 0xb31   :  { %1959 = vmatprep.subr.mxu0 %v2160_v0  ;;  %1414 = vmatprep.subr.mxu1 %v2296_v53 }
 0xb32   :  { %1960 = vmatpush3.msra.mxu0 %v2369_v32  ;;  %1961 = vmatprep.mubr.msk.f32.mxu0 %vm2162_vm4, %v2160_v0 }
 0xb33   :  { %1415 = vmatpush1.msra.mxu1 %v2299_v54  ;;  %1448 = vmatprep.mubr.f32.mxu1 %v2160_v0 }
 0xb34   :  { %1964 = vmatprep.subr.mxu0 %v2160_v0  ;;  %1576 = vmatprep.subr.mxu1 %v2255_v39  ;;  %v1293_v39 = vrot.slane %v2579_v34, 6 }
 0xbe3   :  { %v1202_v56 = vpop.f32.mrf.mxu0  ;;  %v1273_v58 = vpop.f32.mrf.mxu1 }
 0xbe4   :  { %v1203_v60 = vadd.f32 %v1202_v56, %v2312_v3  ;;  %v1280_v61 = vrot.slane %v1273_v58, 4 }
 0xbe5   :  { %v1944_v62 = vpop.f32.mrf.mxu0  ;;  %v1275_v63 = vpop.f32.mrf.mxu1 }
 0xbe6   :  { %1206 = vst.msk [vmem:[#allocation8 + $0x8] sm:$0x3] %vm509_vm5, %v1203_v60  ;;  %v1284_v2 = vadd.f32 %v1280_v61, %v2520_v14  ;;  %v1281_v4 = vrot.slane %v1275_v63, 4 }
 0xbe8   :  { %2049 = vtanh.f32 %v1284_v2  ;;  %v1285_v6 = vadd.f32 %v1281_v4, %v2525_v18 }
 0xbea   :  { %2051 = vtanh.f32 %v1285_v6  ;;  %v1654_v6 = vrot.slane %v2312_v3, 6 }
 0xbf5   :  { %v2050_v7 = vpop.eup %2049 }
 0xbf6   :  { %v1288_v8 = vmul.f32 0.5, %v2050_v7 }
 0xbf7   :  { %v2052_v1 = vpop.eup %2051 }
 0xbf8   :  { %v1290_v9 = vadd.f32 0.5, %v1288_v8  ;;  %v1289_v28 = vmul.f32 0.5, %v2052_v1 }
 0xbfa   :  { %v1296_v5 = vmul.f32 %v2052_v1, %v1290_v9  ;;  %v1295_v26 = vmul.f32 %v1293_v39, %v1290_v9  ;;  %v1291_v12 = vadd.f32 0.5, %v1289_v28 }
 0xbfc   :  { %1298 = vrot.lane.b32.xlu1 %v1296_v5, %s2161_s3 }
 0xc6e   :  { %v1299_v10 = vpop.permute.xlu1 %1298 }
 0xc6f   :  { %v2626_v11 = vadd.f32 %v1299_v10, %v1295_v26 }
 0xc71   :  { %2053 = vtanh.f32 %v2626_v11 }
 0xc7e   :  { %v2054_v13 = vpop.eup %2053 }
 0xc7f   :  { %v1303_v15 = vmul.f32 %v2054_v13, %v1291_v12 }
 0xc81   :  { %v1305_v16 = vrot.slane %v1303_v15, 4 }
 0xc83   :  { %1306 = vrot.lane.b32.xlu0 %v1305_v16, %s2161_s3 }
 0xcf5   :  { %v1307_v59 = vpop.permute.xlu0 %1306 }
 0xcf6   :  { %1962 = vmatmul.mubr.msk.f32.vlgmr.msra.gmra.mxu0 %vm125_vm0, %v1307_v59  ;;  %1766 = vmatmul.mubr.msk.f32.vlgmr.msra.gmra.mxu1 %vm125_vm0, %v1307_v59 }
 0xcf7   :  { %1965 = vmatpush3.msra.mxu0 %v2337_v20  ;;  %1577 = vmatpush1.msra.mxu1 %v2257_v40  ;;  %v1309_v40 = vrot.slane %v2312_v3, 2 }
 0xcf8   :  { %1966 = vmatprep.subr.mxu0 %v2160_v0  ;;  %1578 = vmatprep.subr.mxu1 %v2259_v41 }
 0xcf9   :  { %1967 = vmatpush3.msra.mxu0 %v2339_v21  ;;  %1579 = vmatpush1.msra.mxu1 %v2262_v42 }
 0xcfa   :  { %1968 = vmatprep.subr.mxu0 %v2160_v0  ;;  %1580 = vmatprep.subr.mxu1 %v2265_v43 }
 0xcfb   :  { %1969 = vmatpush3.msra.mxu0 %v2343_v22  ;;  %1581 = vmatpush1.msra.mxu1 %v2269_v44 }
 0xcfc   :  { %1970 = vmatprep.subr.mxu0 %v2160_v0  ;;  %1582 = vmatprep.subr.mxu1 %v2272_v45 }
 0xcfd   :  { %1971 = vmatpush3.msra.mxu0 %v2350_v27  ;;  %1583 = vmatpush1.msra.mxu1 %v2275_v46 }
 0xcfe   :  { %1972 = vmatprep.subr.mxu0 %v2160_v0  ;;  %1584 = vmatprep.subr.mxu1 %v2278_v47 }
 0xcff   :  { %1973 = vmatpush3.msra.mxu0 %v2357_v29  ;;  %1585 = vmatpush1.msra.mxu1 %v2281_v48 }
 0xd00   :  { %1974 = vmatprep.subr.mxu0 %v2160_v0  ;;  %1586 = vmatprep.subr.mxu1 %v2284_v49 }
 0xd01   :  { %1975 = vmatpush3.msra.mxu0 %v2361_v30  ;;  %1587 = vmatpush1.msra.mxu1 %v2287_v50 }
 0xd02   :  { %1976 = vmatprep.subr.mxu0 %v2160_v0  ;;  %1588 = vmatprep.subr.mxu1 %v2290_v51 }
 0xd03   :  { %1977 = vmatpush3.msra.mxu0 %v2365_v31  ;;  %1589 = vmatpush1.msra.mxu1 %v2293_v52  ;;  %v1470_v52 = vrot.slane %v2626_v11, 6 }
 0xd04   :  { %1978 = vmatprep.subr.mxu0 %v2160_v0  ;;  %1590 = vmatprep.subr.mxu1 %v2296_v53 }
 0xd05   :  { %1979 = vmatpush3.msra.mxu0 %v2369_v32  ;;  %1980 = vmatprep.mubr.msk.f32.mxu0 %vm2162_vm4, %v2160_v0 }
 0xd06   :  { %1591 = vmatpush1.msra.mxu1 %v2299_v54  ;;  %1624 = vmatprep.mubr.f32.mxu1 %v2160_v0 }
 0xd07   :  { %1983 = vmatprep.subr.mxu0 %v2160_v0 }
 0xdb6   :  { %v1379_v41 = vpop.f32.mrf.mxu0  ;;  %v1450_v42 = vpop.f32.mrf.mxu1 }
 0xdb7   :  { %v1380_v43 = vadd.f32 %v1379_v41, %v1309_v40  ;;  %v1457_v44 = vrot.slane %v1450_v42, 2 }
 0xdb8   :  { %v1963_v45 = vpop.f32.mrf.mxu0  ;;  %v1452_v46 = vpop.f32.mrf.mxu1 }
 0xdb9   :  { %1383 = vst.msk [vmem:[#allocation8 + $0xa] sm:$0x3] %vm509_vm5, %v1380_v43  ;;  %v1461_v47 = vadd.f32 %v1457_v44, %v2520_v14  ;;  %v1458_v48 = vrot.slane %v1452_v46, 2 }
 0xdbb   :  { %2055 = vtanh.f32 %v1461_v47  ;;  %v1462_v49 = vadd.f32 %v1458_v48, %v2525_v18 }
 0xdbd   :  { %2057 = vtanh.f32 %v1462_v49 }
 0xdc8   :  { %v2056_v50 = vpop.eup %2055 }
 0xdc9   :  { %v1465_v51 = vmul.f32 0.5, %v2056_v50 }
 0xdca   :  { %v2058_v54 = vpop.eup %2057 }
 0xdcb   :  { %v1467_v53 = vadd.f32 0.5, %v1465_v51  ;;  %v1466_v34 = vmul.f32 0.5, %v2058_v54 }
 0xdcd   :  { %v1473_v17 = vmul.f32 %v2058_v54, %v1467_v53  ;;  %v1472_v19 = vmul.f32 %v1470_v52, %v1467_v53  ;;  %v1468_v14 = vadd.f32 0.5, %v1466_v34 }
 0xdcf   :  { %1475 = vrot.lane.b32.xlu1 %v1473_v17, %s2161_s3 }
 0xe41   :  { %v1476_v25 = vpop.permute.xlu1 %1475 }
 0xe42   :  { %v1478_v33 = vadd.f32 %v1476_v25, %v1472_v19 }
 0xe44   :  { %2059 = vtanh.f32 %v1478_v33 }
 0xe51   :  { %v2060_v35 = vpop.eup %2059 }
 0xe52   :  { %v1480_v57 = vmul.f32 %v2060_v35, %v1468_v14 }
 0xe54   :  { %v1482_v36 = vrot.slane %v1480_v57, 6 }
 0xe56   :  { %1483 = vrot.lane.b32.xlu0 %v1482_v36, %s2161_s3 }
 0xec8   :  { %v1484_v18 = vpop.permute.xlu0 %1483 }
 0xec9   :  { %1981 = vmatmul.mubr.msk.f32.vlgmr.msra.gmra.mxu0 %vm125_vm0, %v1484_v18  ;;  %1768 = vmatmul.mubr.msk.f32.vlgmr.msra.gmra.mxu1 %vm125_vm0, %v1484_v18 }
 0xeca   :  { %1984 = vmatpush3.msra.mxu0 %v2337_v20  ;;  %1999 = vmatprep.mubr.msk.f32.mxu0 %vm2162_vm4, %v2160_v0  ;;  %v1485_v20 = vrot.slane %v2312_v3, 4 }
 0xecb   :  { %1985 = vmatprep.subr.mxu0 %v2160_v0 }
 0xecc   :  { %1986 = vmatpush3.msra.mxu0 %v2339_v21 }
 0xecd   :  { %1987 = vmatprep.subr.mxu0 %v2160_v0 }
 0xece   :  { %1988 = vmatpush3.msra.mxu0 %v2343_v22 }
 0xecf   :  { %1989 = vmatprep.subr.mxu0 %v2160_v0 }
 0xed0   :  { %1990 = vmatpush3.msra.mxu0 %v2350_v27 }
 0xed1   :  { %1991 = vmatprep.subr.mxu0 %v2160_v0 }
 0xed2   :  { %1992 = vmatpush3.msra.mxu0 %v2357_v29 }
 0xed3   :  { %1993 = vmatprep.subr.mxu0 %v2160_v0 }
 0xed4   :  { %1994 = vmatpush3.msra.mxu0 %v2361_v30 }
 0xed5   :  { %1995 = vmatprep.subr.mxu0 %v2160_v0 }
 0xed6   :  { %1996 = vmatpush3.msra.mxu0 %v2365_v31 }
 0xed7   :  { %1997 = vmatprep.subr.mxu0 %v2160_v0  ;;  %v1640_v0 = vrot.slane %v1478_v33, 6 }
 0xed8   :  { %1998 = vmatpush3.msra.mxu0 %v2369_v32 }
 0xf89   :  { %v1555_v21 = vpop.f32.mrf.mxu0  ;;  %v1626_v22 = vpop.f32.mrf.mxu1 }
 0xf8a   :  { %v1556_v27 = vadd.f32 %v1555_v21, %v1485_v20  ;;  %v1631_v37 = vadd.f32 %v1626_v22, %v2231_v23 }
 0xf8b   :  { %v1982_v29 = vpop.f32.mrf.mxu0  ;;  %v1628_v38 = vpop.f32.mrf.mxu1 }
 0xf8c   :  { %1559 = vst.msk [vmem:[#allocation8 + $0xc] sm:$0x3] %vm509_vm5, %v1556_v27  ;;  %2061 = vtanh.f32 %v1631_v37  ;;  %v1632_v30 = vadd.f32 %v1628_v38, %v2233_v24 }
 0xf8e   :  { %2063 = vtanh.f32 %v1632_v30 }
 0xf99   :  { %v2062_v31 = vpop.eup %2061 }
 0xf9a   :  { %v1635_v55 = vmul.f32 0.5, %v2062_v31 }
 0xf9b   :  { %v2064_v32 = vpop.eup %2063 }
 0xf9c   :  { %v1637_v56 = vadd.f32 0.5, %v1635_v55  ;;  %v1636_v23 = vmul.f32 0.5, %v2064_v32 }
 0xf9e   :  { %v1643_v58 = vmul.f32 %v2064_v32, %v1637_v56  ;;  %v1642_v60 = vmul.f32 %v1640_v0, %v1637_v56  ;;  %v1638_v63 = vadd.f32 0.5, %v1636_v23 }
 0xfa0   :  { %1645 = vrot.lane.b32.xlu1 %v1643_v58, %s2161_s3 }
0x1012   :  { %v1646_v61 = vpop.permute.xlu1 %1645 }
0x1013   :  { %v1648_v62 = vadd.f32 %v1646_v61, %v1642_v60 }
0x1015   :  { %2065 = vtanh.f32 %v1648_v62 }
0x1022   :  { %v2066_v2 = vpop.eup %2065 }
0x1023   :  { %v1650_v4 = vmul.f32 %v2066_v2, %v1638_v63 }
0x1025   :  { %1652 = vrot.lane.b32.xlu0 %v1650_v4, %s2161_s3 }
0x1097   :  { %v1653_v24 = vpop.permute.xlu0 %1652 }
0x1098   :  { %2000 = vmatmul.mubr.msk.f32.vlgmr.msra.gmra.mxu0 %vm125_vm0, %v1653_v24 }
0x1158   :  { %v1724_v7 = vpop.f32.mrf.mxu0 }
0x1159   :  { %v1725_v8 = vadd.f32 %v1724_v7, %v1654_v6 }
0x115a   :  { %v2001_v39 = vpop.f32.mrf.mxu0 }
0x115b   :  { %1728 = vst.msk [vmem:[#allocation8 + $0xe] sm:$0x3] %vm509_vm5, %v1725_v8 }
0x115c   :  { %2138 = shalt.err (!%p2135_p5)
}
0x115d   :  { %1740 = dma.vmem_to_hbm [thread:$0]  %s1735_s10, 256, %s2715_s8, [#allocation4], %s2158_s4, %s2158_s4, %s2159_s20  }
0x115e   :  { %2151 = dma.done.wait [#allocation4], 256  }
0x115f   :  { %2152 = vsyncadd [#allocation4], 4294967040 }
0x1160   :  { %1744 = vsyncpa [#allocation3], 1 }
0x1161   :  { %1745 = vsyncpa [#allocation6], 1 }
0x1162   :  { %1746 = vsyncpa [#allocation4], 1 }

</bundles_post_ra>
